<compile_context>
chip_gen: v7x
topology: tpu7x:2x2x1
jax: 0.10.0
libtpu: 0.0.40
codegen_flags: <defaults>
</compile_context>

<pallas_src>
import math
from functools import partial

import numpy as np
import jax
import jax.numpy as jnp
from jax import lax
from jax.experimental import pallas as pl
from jax.experimental.pallas import tpu as pltpu

EPS = 1e-6


# ----------------------------------------------------------------------------- helpers
def _layernorm(x, g, b, eps):
    # Matches the custom PyTorch LayerNorm: torch.std() uses the unbiased (N-1)
    # estimator and eps is added to the *std* (not the variance).
    d = x.shape[-1]
    mean = jnp.mean(x, axis=-1, keepdims=True)
    var = jnp.sum((x - mean) ** 2, axis=-1, keepdims=True) / (d - 1)
    return g * (x - mean) / (jnp.sqrt(var) + eps) + b


def _gelu(x):
    return 0.5 * x * (1.0 + jnp.tanh(math.sqrt(2.0 / math.pi) * (x + 0.044715 * x ** 3)))


# ----------------------------------------------------------------------------- fused kernel
def transformer_kernel(x_ref,
                       ln1g_ref, ln1b_ref,
                       wq_ref, bq_ref, wk_ref, bk_ref, wv_ref, bv_ref,
                       wo_ref, bo_ref,
                       ln2g_ref, ln2b_ref,
                       w1_ref, b1_ref, w2_ref, b2_ref,
                       lnfg_ref, lnfb_ref,
                       y_ref,
                       acc_ref,
                       *, n_head, head_dim, n_layer, eps):
    l = pl.program_id(1)                                # layer index ("arbitrary" axis)
    T, D = acc_ref.shape

    # First layer of each batch block: load the embeddings into the resident
    # VMEM accumulator.  It stays in VMEM across all layers of this batch block.
    @pl.when(l == 0)
    def _():
        acc_ref[...] = x_ref[0]

    x = acc_ref[...]                                     # (T, D) f32, resident activation

    # -------- LayerNorm1 + Q/K/V projections (bf16 MXU inputs, f32 accumulation)
    h1 = _layernorm(x, ln1g_ref[0], ln1b_ref[0], eps)
    h1b = h1.astype(jnp.bfloat16)
    q = jnp.dot(h1b, wq_ref[0], preferred_element_type=jnp.float32) + bq_ref[0]
    k = jnp.dot(h1b, wk_ref[0], preferred_element_type=jnp.float32) + bk_ref[0]
    v = jnp.dot(h1b, wv_ref[0], preferred_element_type=jnp.float32) + bv_ref[0]
    q = q * (1.0 / math.sqrt(head_dim))                  # fold attention scale into q

    # -------- split heads -> (H, T, hd) via lane slices stacked on a new leading dim
    def split_heads(m):
        return jnp.stack(
            [m[:, h * head_dim:(h + 1) * head_dim] for h in range(n_head)], axis=0)

    q3 = split_heads(q).astype(jnp.bfloat16)
    k3 = split_heads(k).astype(jnp.bfloat16)
    v3 = split_heads(v).astype(jnp.bfloat16)

    # -------- causal attention, batched over heads (one dot_general per stage)
    s = lax.dot_general(q3, k3, (((2,), (2,)), ((0,), (0,))),
                        preferred_element_type=jnp.float32)          # (H, T, T)
    rows = lax.broadcasted_iota(jnp.int32, (n_head, T, T), 1)
    cols = lax.broadcasted_iota(jnp.int32, (n_head, T, T), 2)
    s = jnp.where(rows >= cols, s, -jnp.inf)                          # causal mask
    s = s - jnp.max(s, axis=-1, keepdims=True)
    p = jnp.exp(s)
    p = p * pl.reciprocal(jnp.sum(p, axis=-1, keepdims=True), approx=True)
    o = lax.dot_general(p.astype(jnp.bfloat16), v3, (((2,), (1,)), ((0,), (0,))),
                        preferred_element_type=jnp.float32)           # (H, T, hd)

    # -------- faithful PyTorch recombination: out.transpose(-2,-1).view(T, C)
    # The required flat order is (head, head_dim, time).  Build it with 2-D
    # transposes + concats + one-hot row-select matmuls (layout-friendly) rather
    # than a general reshape.
    X = jnp.concatenate([o[h].T for h in range(n_head)], axis=0)       # (D, T)
    if D % T == 0:
        r = D // T
        row_t = lax.broadcasted_iota(jnp.int32, (T, D), 0)
        col_c = lax.broadcasted_iota(jnp.int32, (T, D), 1)
        pieces = []
        for a in range(r):
            sel = (col_c == row_t * r + a).astype(jnp.float32)         # selects rows t*r + a
            pieces.append(jnp.dot(sel, X, preferred_element_type=jnp.float32))
        mixed = jnp.concatenate(pieces, axis=-1)                       # (T, D)
    else:
        mixed = X.reshape(T, D)    # generic fallback (unused for this config)

    # -------- attention output projection + residual 1
    a_out = jnp.dot(mixed.astype(jnp.bfloat16), wo_ref[0],
                    preferred_element_type=jnp.float32) + bo_ref[0]
    x1 = x + a_out

    # -------- LayerNorm2 + GELU feed-forward + residual 2
    h2 = _layernorm(x1, ln2g_ref[0], ln2b_ref[0], eps)
    z = jnp.dot(h2.astype(jnp.bfloat16), w1_ref[0],
                preferred_element_type=jnp.float32) + b1_ref[0]
    z = _gelu(z)
    z = jnp.dot(z.astype(jnp.bfloat16), w2_ref[0],
                preferred_element_type=jnp.float32) + b2_ref[0]
    x2 = x1 + z

    acc_ref[...] = x2                                    # stays resident for the next layer

    # -------- final LayerNorm, fused after the last layer
    @pl.when(l == n_layer - 1)
    def _():
        y_ref[0] = _layernorm(x2, lnfg_ref[...], lnfb_ref[...], eps)


# ----------------------------------------------------------------------------- wrapper
def transformer_forward(tokens, params, cfg):
    B, T = tokens.shape
    D = cfg["d_model"]
    H = cfg["n_head"]
    L = cfg["n_layer"]
    hd = D // H

    # Embedding gather + positional add stay in XLA (tiny, data-dependent gather).
    tok = jnp.take(params["token_emb"], tokens, axis=0)                 # (B, T, D)
    pos = jnp.take(params["pos_emb"], jnp.arange(T), axis=0)[None]      # (1, T, D)
    x = (tok + pos).astype(jnp.float32)                                  # dropout == identity

    blocks = params["blocks"]
    stk = lambda name: jnp.stack([blk[name] for blk in blocks], axis=0)  # (L, ...)
    ln1g, ln1b = stk("ln1_g"), stk("ln1_b")
    wq, bq = stk("wq"), stk("bq")
    wk, bk = stk("wk"), stk("bk")
    wv, bv = stk("wv"), stk("bv")
    wo, bo = stk("wo"), stk("bo")
    ln2g, ln2b = stk("ln2_g"), stk("ln2_b")
    w1, b1 = stk("w1"), stk("b1")
    w2, b2 = stk("w2"), stk("b2")

    def wspec(arr):   # stacked per-layer tensor: block = one layer's slab
        return pl.BlockSpec((1,) + arr.shape[1:], lambda b, l: (l, 0, 0))

    def cspec(arr):   # shared (non per-layer) 2-D parameter, full block
        return pl.BlockSpec(arr.shape, lambda b, l: (0, 0))

    return pl.pallas_call(
        partial(transformer_kernel, n_head=H, head_dim=hd, n_layer=L, eps=EPS),
        out_shape=jax.ShapeDtypeStruct((B, T, D), jnp.float32),
        grid=(B, L),
        in_specs=[pl.BlockSpec((1, T, D), lambda b, l: (b, 0, 0)),       # embeddings
                  wspec(ln1g), wspec(ln1b),
                  wspec(wq), wspec(bq), wspec(wk), wspec(bk), wspec(wv), wspec(bv),
                  wspec(wo), wspec(bo),
                  wspec(ln2g), wspec(ln2b),
                  wspec(w1), wspec(b1), wspec(w2), wspec(b2),
                  cspec(params["lnf_g"]), cspec(params["lnf_b"])],
        out_specs=pl.BlockSpec((1, T, D), lambda b, l: (b, 0, 0)),
        scratch_shapes=[pltpu.VMEM((T, D), jnp.float32)],                # resident activation
        compiler_params=pltpu.CompilerParams(
            dimension_semantics=("parallel", "arbitrary")),
    )(x, ln1g, ln1b, wq, bq, wk, bk, wv, bv, wo, bo,
      ln2g, ln2b, w1, b1, w2, b2, params["lnf_g"], params["lnf_b"])


# ----------------------------------------------------------------------------- reference (pure JAX)
def reference_forward(tokens, params, cfg):
    B, T = tokens.shape
    D = cfg["d_model"]
    H = cfg["n_head"]
    hd = D // H
    hp = jax.lax.Precision.HIGHEST

    def ln(z, g, b):
        d = z.shape[-1]
        mean = z.mean(-1, keepdims=True)
        std = jnp.sqrt(((z - mean) ** 2).sum(-1, keepdims=True) / (d - 1))
        return g * (z - mean) / (std + EPS) + b

    tok = jnp.take(params["token_emb"], tokens, axis=0)
    pos = jnp.take(params["pos_emb"], jnp.arange(T), axis=0)[None]
    x = tok + pos
    for blk in params["blocks"]:
        h = ln(x, blk["ln1_g"], blk["ln1_b"])
        q = (jnp.matmul(h, blk["wq"], precision=hp) + blk["bq"]).reshape(B, T, H, hd).transpose(0, 2, 1, 3)
        k = (jnp.matmul(h, blk["wk"], precision=hp) + blk["bk"]).reshape(B, T, H, hd).transpose(0, 2, 1, 3)
        v = (jnp.matmul(h, blk["wv"], precision=hp) + blk["bv"]).reshape(B, T, H, hd).transpose(0, 2, 1, 3)
        attn = jnp.matmul(q, jnp.swapaxes(k, -2, -1), precision=hp) / math.sqrt(hd)
        mask = jnp.tril(jnp.ones((T, T))) == 0.0
        attn = jnp.where(mask, -jnp.inf, attn)
        attn = jax.nn.softmax(attn, axis=-1)
        out = jnp.matmul(attn, v, precision=hp)                           # (B, H, T, hd)
        out = jnp.swapaxes(out, -2, -1).reshape(B, T, D)                  # faithful reshuffle
        out = jnp.matmul(out, blk["wo"], precision=hp) + blk["bo"]
        x = x + out
        h2 = ln(x, blk["ln2_g"], blk["ln2_b"])
        z = _gelu(jnp.matmul(h2, blk["w1"], precision=hp) + blk["b1"])
        z = jnp.matmul(z, blk["w2"], precision=hp) + blk["b2"]
        x = x + z
    return ln(x, params["lnf_g"], params["lnf_b"])


# ----------------------------------------------------------------------------- params
def init_params(key, cfg):
    D, Fi = cfg["d_model"], cfg["d_inter"]

    def linear(k, din, dout):
        k1, k2 = jax.random.split(k)
        bound = 1.0 / math.sqrt(din)
        w = jax.random.uniform(k1, (din, dout), jnp.float32, -bound, bound)
        b = jax.random.uniform(k2, (1, dout), jnp.float32, -bound, bound)
        # Weight matrices are stored in bf16 (MXU-friendly); the f32 reference
        # uses the same (quantized) weight values, so the comparison isolates
        # the kernel's bf16-input matmul / approx-reciprocal error.
        return w.astype(jnp.bfloat16), b

    keys = jax.random.split(key, cfg["n_layer"] + 2)
    params = {
        "token_emb": 0.02 * jax.random.normal(keys[0], (cfg["vocab_size"], D), jnp.float32),
        "pos_emb": 0.02 * jax.random.normal(keys[1], (cfg["max_len"], D), jnp.float32),
        # This PyTorch LayerNorm initializes BOTH a2 and b2 to ones.
        "lnf_g": jnp.ones((1, D), jnp.float32),
        "lnf_b": jnp.ones((1, D), jnp.float32),
        "blocks": [],
    }
    for i in range(cfg["n_layer"]):
        ks = jax.random.split(keys[2 + i], 6)
        wq, bq = linear(ks[0], D, D)
        wk, bk = linear(ks[1], D, D)
        wv, bv = linear(ks[2], D, D)
        wo, bo = linear(ks[3], D, D)
        w1, b1 = linear(ks[4], D, Fi)
        w2, b2 = linear(ks[5], Fi, D)
        params["blocks"].append(dict(
            ln1_g=jnp.ones((1, D), jnp.float32), ln1_b=jnp.ones((1, D), jnp.float32),
            wq=wq, bq=bq, wk=wk, bk=bk, wv=wv, bv=bv, wo=wo, bo=bo,
            ln2_g=jnp.ones((1, D), jnp.float32), ln2_b=jnp.ones((1, D), jnp.float32),
            w1=w1, b1=b1, w2=w2, b2=b2))
    return params


# ----------------------------------------------------------------------------- main
if __name__ == "__main__":
    cfg = dict(vocab_size=50, max_len=16, d_model=32, n_head=4, d_inter=64, n_layer=2)
    B, T = 2, 8

    key = jax.random.PRNGKey(0)
    key, pkey, tkey = jax.random.split(key, 3)
    params = init_params(pkey, cfg)
    tokens = jax.random.randint(tkey, (B, T), 0, cfg["vocab_size"])

    out = transformer_forward(tokens, params, cfg)
    out = jax.block_until_ready(out)

    ref = reference_forward(tokens, params, cfg)
    # bf16 matmul inputs (f32 accumulation) + approx reciprocal vs. an f32
    # HIGHEST-precision reference => slightly looser tolerance than pure f32.
    np.testing.assert_allclose(np.asarray(out), np.asarray(ref), rtol=2e-2, atol=2e-2)

    print("KERNEL_OK")
</pallas_src>

<mosaic_0001>
module attributes {stable_mosaic.version = 11 : i64} {
  func.func @transformer_kernel(%arg0: i32, %arg1: i32, %arg2: memref<1x8x32xf32, #tpu.memory_space<vmem>>, %arg3: memref<1x1x32xf32, #tpu.memory_space<vmem>>, %arg4: memref<1x1x32xf32, #tpu.memory_space<vmem>>, %arg5: memref<1x32x32xbf16, #tpu.memory_space<vmem>>, %arg6: memref<1x1x32xf32, #tpu.memory_space<vmem>>, %arg7: memref<1x32x32xbf16, #tpu.memory_space<vmem>>, %arg8: memref<1x1x32xf32, #tpu.memory_space<vmem>>, %arg9: memref<1x32x32xbf16, #tpu.memory_space<vmem>>, %arg10: memref<1x1x32xf32, #tpu.memory_space<vmem>>, %arg11: memref<1x32x32xbf16, #tpu.memory_space<vmem>>, %arg12: memref<1x1x32xf32, #tpu.memory_space<vmem>>, %arg13: memref<1x1x32xf32, #tpu.memory_space<vmem>>, %arg14: memref<1x1x32xf32, #tpu.memory_space<vmem>>, %arg15: memref<1x32x64xbf16, #tpu.memory_space<vmem>>, %arg16: memref<1x1x64xf32, #tpu.memory_space<vmem>>, %arg17: memref<1x64x32xbf16, #tpu.memory_space<vmem>>, %arg18: memref<1x1x32xf32, #tpu.memory_space<vmem>>, %arg19: memref<1x32xf32, #tpu.memory_space<vmem>>, %arg20: memref<1x32xf32, #tpu.memory_space<vmem>>, %arg21: memref<1x8x32xf32, #tpu.memory_space<vmem>>, %arg22: memref<8x32xf32, #tpu.memory_space<vmem>>) attributes {dimension_semantics = [#tpu.dimension_semantics<parallel>, #tpu.dimension_semantics<arbitrary>], iteration_bounds = array<i64: 2, 2>, scalar_prefetch = 0 : i64, scratch_operands = 1 : i64, tpu.core_type = #tpu.core_type<tc>, window_params = [{transform_indices = @transform_0, window_bounds = array<i64: 1, 8, 32>}, {transform_indices = @transform_1, window_bounds = array<i64: 1, 1, 32>}, {transform_indices = @transform_2, window_bounds = array<i64: 1, 1, 32>}, {transform_indices = @transform_3, window_bounds = array<i64: 1, 32, 32>}, {transform_indices = @transform_4, window_bounds = array<i64: 1, 1, 32>}, {transform_indices = @transform_5, window_bounds = array<i64: 1, 32, 32>}, {transform_indices = @transform_6, window_bounds = array<i64: 1, 1, 32>}, {transform_indices = @transform_7, window_bounds = array<i64: 1, 32, 32>}, {transform_indices = @transform_8, window_bounds = array<i64: 1, 1, 32>}, {transform_indices = @transform_9, window_bounds = array<i64: 1, 32, 32>}, {transform_indices = @transform_10, window_bounds = array<i64: 1, 1, 32>}, {transform_indices = @transform_11, window_bounds = array<i64: 1, 1, 32>}, {transform_indices = @transform_12, window_bounds = array<i64: 1, 1, 32>}, {transform_indices = @transform_13, window_bounds = array<i64: 1, 32, 64>}, {transform_indices = @transform_14, window_bounds = array<i64: 1, 1, 64>}, {transform_indices = @transform_15, window_bounds = array<i64: 1, 64, 32>}, {transform_indices = @transform_16, window_bounds = array<i64: 1, 1, 32>}, {pipeline_mode = #tpu.pipeline_mode<synchronous>, transform_indices = @transform_17, window_bounds = array<i64: 1, 32>}, {pipeline_mode = #tpu.pipeline_mode<synchronous>, transform_indices = @transform_18, window_bounds = array<i64: 1, 32>}, {transform_indices = @transform_19, window_bounds = array<i64: 1, 8, 32>}]} {
    %c0_i32 = arith.constant 0 : i32
    %0 = arith.cmpi eq, %arg1, %c0_i32 : i32
    %1 = arith.extui %0 : i1 to i32
    %c0_i32_0 = arith.constant 0 : i32
    %2 = arith.cmpi ne, %1, %c0_i32_0 : i32
    scf.if %2 {
      %c0_87 = arith.constant 0 : index
      %c0_88 = arith.constant 0 : index
      %c0_89 = arith.constant 0 : index
      %219 = vector.load %arg2[%c0_87, %c0_88, %c0_89] : memref<1x8x32xf32, #tpu.memory_space<vmem>>, vector<1x8x32xf32>
      %220 = vector.shape_cast %219 : vector<1x8x32xf32> to vector<8x32xf32>
      %c0_90 = arith.constant 0 : index
      %c0_91 = arith.constant 0 : index
      %221 = vector.load %arg22[%c0_90, %c0_91] : memref<8x32xf32, #tpu.memory_space<vmem>>, vector<8x32xf32>
      tpu.vector_store %arg22[%c0_90, %c0_91], %220 {strides = array<i32>} : memref<8x32xf32, #tpu.memory_space<vmem>>, vector<8x32xf32>,
    } else {
    }
    %c0 = arith.constant 0 : index
    %c0_1 = arith.constant 0 : index
    %3 = vector.load %arg22[%c0, %c0_1] : memref<8x32xf32, #tpu.memory_space<vmem>>, vector<8x32xf32>
    %c0_2 = arith.constant 0 : index
    %c0_3 = arith.constant 0 : index
    %c0_4 = arith.constant 0 : index
    %4 = vector.load %arg3[%c0_2, %c0_3, %c0_4] : memref<1x1x32xf32, #tpu.memory_space<vmem>>, vector<1x1x32xf32>
    %5 = vector.shape_cast %4 : vector<1x1x32xf32> to vector<1x32xf32>
    %c0_5 = arith.constant 0 : index
    %c0_6 = arith.constant 0 : index
    %c0_7 = arith.constant 0 : index
    %6 = vector.load %arg4[%c0_5, %c0_6, %c0_7] : memref<1x1x32xf32, #tpu.memory_space<vmem>>, vector<1x1x32xf32>
    %7 = vector.shape_cast %6 : vector<1x1x32xf32> to vector<1x32xf32>
    %cst = arith.constant dense<0.000000e+00> : vector<8xf32>
    %8 = vector.multi_reduction <add>, %3, %cst [1] : vector<8x32xf32> to vector<8xf32>
    %9 = vector.shape_cast %8 : vector<8xf32> to vector<8x1xf32>
    %cst_8 = arith.constant 3.200000e+01 : f32
    %10 = vector.broadcast %cst_8 : f32 to vector<8x1xf32>
    %11 = arith.divf %9, %10 : vector<8x1xf32>
    %12 = vector.broadcast %11 : vector<8x1xf32> to vector<8x32xf32>
    %13 = arith.subf %3, %12 : vector<8x32xf32>
    %14 = arith.mulf %13, %13 : vector<8x32xf32>
    %cst_9 = arith.constant dense<0.000000e+00> : vector<8xf32>
    %15 = vector.multi_reduction <add>, %14, %cst_9 [1] : vector<8x32xf32> to vector<8xf32>
    %16 = vector.shape_cast %15 : vector<8xf32> to vector<8x1xf32>
    %cst_10 = arith.constant 3.100000e+01 : f32
    %17 = vector.broadcast %cst_10 : f32 to vector<8x1xf32>
    %18 = arith.divf %16, %17 : vector<8x1xf32>
    %19 = vector.broadcast %11 : vector<8x1xf32> to vector<8x32xf32>
    %20 = arith.subf %3, %19 : vector<8x32xf32>
    %21 = vector.broadcast %5 : vector<1x32xf32> to vector<8x32xf32>
    %22 = arith.mulf %21, %20 : vector<8x32xf32>
    %23 = math.sqrt %18 : vector<8x1xf32>
    %cst_11 = arith.constant 9.99999997E-7 : f32
    %24 = vector.broadcast %cst_11 : f32 to vector<8x1xf32>
    %25 = arith.addf %23, %24 : vector<8x1xf32>
    %26 = vector.broadcast %25 : vector<8x1xf32> to vector<8x32xf32>
    %27 = arith.divf %22, %26 : vector<8x32xf32>
    %28 = vector.broadcast %7 : vector<1x32xf32> to vector<8x32xf32>
    %29 = arith.addf %27, %28 : vector<8x32xf32>
    %30 = arith.truncf %29 : vector<8x32xf32> to vector<8x32xbf16>
    %c0_12 = arith.constant 0 : index
    %c0_13 = arith.constant 0 : index
    %c0_14 = arith.constant 0 : index
    %31 = vector.load %arg5[%c0_12, %c0_13, %c0_14] : memref<1x32x32xbf16, #tpu.memory_space<vmem>>, vector<1x32x32xbf16>
    %32 = vector.shape_cast %31 : vector<1x32x32xbf16> to vector<32x32xbf16>
    %cst_15 = arith.constant dense<0.000000e+00> : vector<8x32xf32>
    %33 = tpu.matmul %30, %32, %cst_15 {dimension_numbers = #tpu.dot_dimension_numbers<[1], [0], [0], [1], [0, 0, 1, 1], [], []>} : vector<8x32xbf16>, vector<32x32xbf16>, vector<8x32xf32> -> vector<8x32xf32>
    %c0_16 = arith.constant 0 : index
    %c0_17 = arith.constant 0 : index
    %c0_18 = arith.constant 0 : index
    %34 = vector.load %arg6[%c0_16, %c0_17, %c0_18] : memref<1x1x32xf32, #tpu.memory_space<vmem>>, vector<1x1x32xf32>
    %35 = vector.shape_cast %34 : vector<1x1x32xf32> to vector<1x32xf32>
    %36 = vector.broadcast %35 : vector<1x32xf32> to vector<8x32xf32>
    %37 = arith.addf %33, %36 : vector<8x32xf32>
    %c0_19 = arith.constant 0 : index
    %c0_20 = arith.constant 0 : index
    %c0_21 = arith.constant 0 : index
    %38 = vector.load %arg7[%c0_19, %c0_20, %c0_21] : memref<1x32x32xbf16, #tpu.memory_space<vmem>>, vector<1x32x32xbf16>
    %39 = vector.shape_cast %38 : vector<1x32x32xbf16> to vector<32x32xbf16>
    %cst_22 = arith.constant dense<0.000000e+00> : vector<8x32xf32>
    %40 = tpu.matmul %30, %39, %cst_22 {dimension_numbers = #tpu.dot_dimension_numbers<[1], [0], [0], [1], [0, 0, 1, 1], [], []>} : vector<8x32xbf16>, vector<32x32xbf16>, vector<8x32xf32> -> vector<8x32xf32>
    %c0_23 = arith.constant 0 : index
    %c0_24 = arith.constant 0 : index
    %c0_25 = arith.constant 0 : index
    %41 = vector.load %arg8[%c0_23, %c0_24, %c0_25] : memref<1x1x32xf32, #tpu.memory_space<vmem>>, vector<1x1x32xf32>
    %42 = vector.shape_cast %41 : vector<1x1x32xf32> to vector<1x32xf32>
    %43 = vector.broadcast %42 : vector<1x32xf32> to vector<8x32xf32>
    %44 = arith.addf %40, %43 : vector<8x32xf32>
    %c0_26 = arith.constant 0 : index
    %c0_27 = arith.constant 0 : index
    %c0_28 = arith.constant 0 : index
    %45 = vector.load %arg9[%c0_26, %c0_27, %c0_28] : memref<1x32x32xbf16, #tpu.memory_space<vmem>>, vector<1x32x32xbf16>
    %46 = vector.shape_cast %45 : vector<1x32x32xbf16> to vector<32x32xbf16>
    %cst_29 = arith.constant dense<0.000000e+00> : vector<8x32xf32>
    %47 = tpu.matmul %30, %46, %cst_29 {dimension_numbers = #tpu.dot_dimension_numbers<[1], [0], [0], [1], [0, 0, 1, 1], [], []>} : vector<8x32xbf16>, vector<32x32xbf16>, vector<8x32xf32> -> vector<8x32xf32>
    %c0_30 = arith.constant 0 : index
    %c0_31 = arith.constant 0 : index
    %c0_32 = arith.constant 0 : index
    %48 = vector.load %arg10[%c0_30, %c0_31, %c0_32] : memref<1x1x32xf32, #tpu.memory_space<vmem>>, vector<1x1x32xf32>
    %49 = vector.shape_cast %48 : vector<1x1x32xf32> to vector<1x32xf32>
    %50 = vector.broadcast %49 : vector<1x32xf32> to vector<8x32xf32>
    %51 = arith.addf %47, %50 : vector<8x32xf32>
    %cst_33 = arith.constant 0.353553385 : f32
    %52 = vector.broadcast %cst_33 : f32 to vector<8x32xf32>
    %53 = arith.mulf %37, %52 : vector<8x32xf32>
    %54 = vector.extract_strided_slice %53 {offsets = [0, 0], sizes = [8, 8], strides = [1, 1]} : vector<8x32xf32> to vector<8x8xf32>
    %55 = vector.extract_strided_slice %53 {offsets = [0, 8], sizes = [8, 8], strides = [1, 1]} : vector<8x32xf32> to vector<8x8xf32>
    %56 = vector.extract_strided_slice %53 {offsets = [0, 16], sizes = [8, 8], strides = [1, 1]} : vector<8x32xf32> to vector<8x8xf32>
    %57 = vector.extract_strided_slice %53 {offsets = [0, 24], sizes = [8, 8], strides = [1, 1]} : vector<8x32xf32> to vector<8x8xf32>
    %58 = vector.shape_cast %54 : vector<8x8xf32> to vector<1x8x8xf32>
    %59 = vector.shape_cast %55 : vector<8x8xf32> to vector<1x8x8xf32>
    %60 = vector.shape_cast %56 : vector<8x8xf32> to vector<1x8x8xf32>
    %61 = vector.shape_cast %57 : vector<8x8xf32> to vector<1x8x8xf32>
    %62 = tpu.concatenate %58, %59, %60, %61 in 0 : vector<1x8x8xf32>, vector<1x8x8xf32>, vector<1x8x8xf32>, vector<1x8x8xf32> -> vector<4x8x8xf32>
    %63 = arith.truncf %62 : vector<4x8x8xf32> to vector<4x8x8xbf16>
    %64 = vector.extract_strided_slice %44 {offsets = [0, 0], sizes = [8, 8], strides = [1, 1]} : vector<8x32xf32> to vector<8x8xf32>
    %65 = vector.extract_strided_slice %44 {offsets = [0, 8], sizes = [8, 8], strides = [1, 1]} : vector<8x32xf32> to vector<8x8xf32>
    %66 = vector.extract_strided_slice %44 {offsets = [0, 16], sizes = [8, 8], strides = [1, 1]} : vector<8x32xf32> to vector<8x8xf32>
    %67 = vector.extract_strided_slice %44 {offsets = [0, 24], sizes = [8, 8], strides = [1, 1]} : vector<8x32xf32> to vector<8x8xf32>
    %68 = vector.shape_cast %64 : vector<8x8xf32> to vector<1x8x8xf32>
    %69 = vector.shape_cast %65 : vector<8x8xf32> to vector<1x8x8xf32>
    %70 = vector.shape_cast %66 : vector<8x8xf32> to vector<1x8x8xf32>
    %71 = vector.shape_cast %67 : vector<8x8xf32> to vector<1x8x8xf32>
    %72 = tpu.concatenate %68, %69, %70, %71 in 0 : vector<1x8x8xf32>, vector<1x8x8xf32>, vector<1x8x8xf32>, vector<1x8x8xf32> -> vector<4x8x8xf32>
    %73 = arith.truncf %72 : vector<4x8x8xf32> to vector<4x8x8xbf16>
    %74 = vector.extract_strided_slice %51 {offsets = [0, 0], sizes = [8, 8], strides = [1, 1]} : vector<8x32xf32> to vector<8x8xf32>
    %75 = vector.extract_strided_slice %51 {offsets = [0, 8], sizes = [8, 8], strides = [1, 1]} : vector<8x32xf32> to vector<8x8xf32>
    %76 = vector.extract_strided_slice %51 {offsets = [0, 16], sizes = [8, 8], strides = [1, 1]} : vector<8x32xf32> to vector<8x8xf32>
    %77 = vector.extract_strided_slice %51 {offsets = [0, 24], sizes = [8, 8], strides = [1, 1]} : vector<8x32xf32> to vector<8x8xf32>
    %78 = vector.shape_cast %74 : vector<8x8xf32> to vector<1x8x8xf32>
    %79 = vector.shape_cast %75 : vector<8x8xf32> to vector<1x8x8xf32>
    %80 = vector.shape_cast %76 : vector<8x8xf32> to vector<1x8x8xf32>
    %81 = vector.shape_cast %77 : vector<8x8xf32> to vector<1x8x8xf32>
    %82 = tpu.concatenate %78, %79, %80, %81 in 0 : vector<1x8x8xf32>, vector<1x8x8xf32>, vector<1x8x8xf32>, vector<1x8x8xf32> -> vector<4x8x8xf32>
    %83 = arith.truncf %82 : vector<4x8x8xf32> to vector<4x8x8xbf16>
    %cst_34 = arith.constant dense<0.000000e+00> : vector<4x8x8xf32>
    %84 = tpu.matmul %63, %73, %cst_34 {dimension_numbers = #tpu.dot_dimension_numbers<[2], [2], [1], [1], [0, 0, 0, 1, 1, 1], [0], [0]>} : vector<4x8x8xbf16>, vector<4x8x8xbf16>, vector<4x8x8xf32> -> vector<4x8x8xf32>
    %85 = tpu.iota {dimensions = array<i32: 1>} : vector<4x8x8xi32>
    %86 = tpu.iota {dimensions = array<i32: 2>} : vector<4x8x8xi32>
    %87 = arith.cmpi sge, %85, %86 : vector<4x8x8xi32>
    %cst_35 = arith.constant 0xFF800000 : f32
    %88 = vector.broadcast %cst_35 : f32 to vector<4x8x8xf32>
    %89 = arith.select %87, %84, %88 : vector<4x8x8xi1>, vector<4x8x8xf32>
    %cst_36 = arith.constant dense<0xFF800000> : vector<4x8xf32>
    %90 = vector.multi_reduction <maximumf>, %89, %cst_36 [2] : vector<4x8x8xf32> to vector<4x8xf32>
    %91 = vector.shape_cast %90 : vector<4x8xf32> to vector<4x8x1xf32>
    %92 = vector.broadcast %91 : vector<4x8x1xf32> to vector<4x8x8xf32>
    %93 = arith.subf %89, %92 : vector<4x8x8xf32>
    %94 = math.exp %93 : vector<4x8x8xf32>
    %cst_37 = arith.constant dense<0.000000e+00> : vector<4x8xf32>
    %95 = vector.multi_reduction <add>, %94, %cst_37 [2] : vector<4x8x8xf32> to vector<4x8xf32>
    %96 = vector.shape_cast %95 : vector<4x8xf32> to vector<4x8x1xf32>
    %97 = tpu.reciprocal %96 {approx = true} : vector<4x8x1xf32> -> vector<4x8x1xf32>
    %98 = vector.broadcast %97 : vector<4x8x1xf32> to vector<4x8x8xf32>
    %99 = arith.mulf %94, %98 : vector<4x8x8xf32>
    %100 = arith.truncf %99 : vector<4x8x8xf32> to vector<4x8x8xbf16>
    %cst_38 = arith.constant dense<0.000000e+00> : vector<4x8x8xf32>
    %101 = tpu.matmul %100, %83, %cst_38 {dimension_numbers = #tpu.dot_dimension_numbers<[2], [1], [1], [2], [0, 0, 0, 1, 1, 2], [0], [0]>} : vector<4x8x8xbf16>, vector<4x8x8xbf16>, vector<4x8x8xf32> -> vector<4x8x8xf32>
    %102 = vector.extract_strided_slice %101 {offsets = [0, 0, 0], sizes = [1, 8, 8], strides = [1, 1, 1]} : vector<4x8x8xf32> to vector<1x8x8xf32>
    %103 = vector.shape_cast %102 : vector<1x8x8xf32> to vector<8x8xf32>
    %104 = tpu.transpose %103, [1, 0] : vector<8x8xf32> -> vector<8x8xf32>
    %105 = vector.extract_strided_slice %101 {offsets = [1, 0, 0], sizes = [1, 8, 8], strides = [1, 1, 1]} : vector<4x8x8xf32> to vector<1x8x8xf32>
    %106 = vector.shape_cast %105 : vector<1x8x8xf32> to vector<8x8xf32>
    %107 = tpu.transpose %106, [1, 0] : vector<8x8xf32> -> vector<8x8xf32>
    %108 = vector.extract_strided_slice %101 {offsets = [2, 0, 0], sizes = [1, 8, 8], strides = [1, 1, 1]} : vector<4x8x8xf32> to vector<1x8x8xf32>
    %109 = vector.shape_cast %108 : vector<1x8x8xf32> to vector<8x8xf32>
    %110 = tpu.transpose %109, [1, 0] : vector<8x8xf32> -> vector<8x8xf32>
    %111 = vector.extract_strided_slice %101 {offsets = [3, 0, 0], sizes = [1, 8, 8], strides = [1, 1, 1]} : vector<4x8x8xf32> to vector<1x8x8xf32>
    %112 = vector.shape_cast %111 : vector<1x8x8xf32> to vector<8x8xf32>
    %113 = tpu.transpose %112, [1, 0] : vector<8x8xf32> -> vector<8x8xf32>
    %114 = tpu.concatenate %104, %107, %110, %113 in 0 : vector<8x8xf32>, vector<8x8xf32>, vector<8x8xf32>, vector<8x8xf32> -> vector<32x8xf32>
    %115 = tpu.iota {dimensions = array<i32: 0>} : vector<8x32xi32>
    %116 = tpu.iota {dimensions = array<i32: 1>} : vector<8x32xi32>
    %c4_i32 = arith.constant 4 : i32
    %117 = vector.broadcast %c4_i32 : i32 to vector<8x32xi32>
    %118 = arith.muli %115, %117 : vector<8x32xi32>
    %c0_i32_39 = arith.constant 0 : i32
    %119 = vector.broadcast %c0_i32_39 : i32 to vector<8x32xi32>
    %120 = arith.addi %118, %119 : vector<8x32xi32>
    %121 = arith.cmpi eq, %116, %120 : vector<8x32xi32>
    %122 = arith.extui %121 : vector<8x32xi1> to vector<8x32xi32>
    %123 = arith.sitofp %122 : vector<8x32xi32> to vector<8x32xf32>
    %cst_40 = arith.constant dense<0.000000e+00> : vector<8x8xf32>
    %124 = tpu.matmul %123, %114, %cst_40 {dimension_numbers = #tpu.dot_dimension_numbers<[1], [0], [0], [1], [0, 0, 1, 1], [], []>} : vector<8x32xf32>, vector<32x8xf32>, vector<8x8xf32> -> vector<8x8xf32>
    %c4_i32_41 = arith.constant 4 : i32
    %125 = vector.broadcast %c4_i32_41 : i32 to vector<8x32xi32>
    %126 = arith.muli %115, %125 : vector<8x32xi32>
    %c1_i32 = arith.constant 1 : i32
    %127 = vector.broadcast %c1_i32 : i32 to vector<8x32xi32>
    %128 = arith.addi %126, %127 : vector<8x32xi32>
    %129 = arith.cmpi eq, %116, %128 : vector<8x32xi32>
    %130 = arith.extui %129 : vector<8x32xi1> to vector<8x32xi32>
    %131 = arith.sitofp %130 : vector<8x32xi32> to vector<8x32xf32>
    %cst_42 = arith.constant dense<0.000000e+00> : vector<8x8xf32>
    %132 = tpu.matmul %131, %114, %cst_42 {dimension_numbers = #tpu.dot_dimension_numbers<[1], [0], [0], [1], [0, 0, 1, 1], [], []>} : vector<8x32xf32>, vector<32x8xf32>, vector<8x8xf32> -> vector<8x8xf32>
    %c4_i32_43 = arith.constant 4 : i32
    %133 = vector.broadcast %c4_i32_43 : i32 to vector<8x32xi32>
    %134 = arith.muli %115, %133 : vector<8x32xi32>
    %c2_i32 = arith.constant 2 : i32
    %135 = vector.broadcast %c2_i32 : i32 to vector<8x32xi32>
    %136 = arith.addi %134, %135 : vector<8x32xi32>
    %137 = arith.cmpi eq, %116, %136 : vector<8x32xi32>
    %138 = arith.extui %137 : vector<8x32xi1> to vector<8x32xi32>
    %139 = arith.sitofp %138 : vector<8x32xi32> to vector<8x32xf32>
    %cst_44 = arith.constant dense<0.000000e+00> : vector<8x8xf32>
    %140 = tpu.matmul %139, %114, %cst_44 {dimension_numbers = #tpu.dot_dimension_numbers<[1], [0], [0], [1], [0, 0, 1, 1], [], []>} : vector<8x32xf32>, vector<32x8xf32>, vector<8x8xf32> -> vector<8x8xf32>
    %c4_i32_45 = arith.constant 4 : i32
    %141 = vector.broadcast %c4_i32_45 : i32 to vector<8x32xi32>
    %142 = arith.muli %115, %141 : vector<8x32xi32>
    %c3_i32 = arith.constant 3 : i32
    %143 = vector.broadcast %c3_i32 : i32 to vector<8x32xi32>
    %144 = arith.addi %142, %143 : vector<8x32xi32>
    %145 = arith.cmpi eq, %116, %144 : vector<8x32xi32>
    %146 = arith.extui %145 : vector<8x32xi1> to vector<8x32xi32>
    %147 = arith.sitofp %146 : vector<8x32xi32> to vector<8x32xf32>
    %cst_46 = arith.constant dense<0.000000e+00> : vector<8x8xf32>
    %148 = tpu.matmul %147, %114, %cst_46 {dimension_numbers = #tpu.dot_dimension_numbers<[1], [0], [0], [1], [0, 0, 1, 1], [], []>} : vector<8x32xf32>, vector<32x8xf32>, vector<8x8xf32> -> vector<8x8xf32>
    %149 = tpu.concatenate %124, %132, %140, %148 in 1 : vector<8x8xf32>, vector<8x8xf32>, vector<8x8xf32>, vector<8x8xf32> -> vector<8x32xf32>
    %150 = arith.truncf %149 : vector<8x32xf32> to vector<8x32xbf16>
    %c0_47 = arith.constant 0 : index
    %c0_48 = arith.constant 0 : index
    %c0_49 = arith.constant 0 : index
    %151 = vector.load %arg11[%c0_47, %c0_48, %c0_49] : memref<1x32x32xbf16, #tpu.memory_space<vmem>>, vector<1x32x32xbf16>
    %152 = vector.shape_cast %151 : vector<1x32x32xbf16> to vector<32x32xbf16>
    %cst_50 = arith.constant dense<0.000000e+00> : vector<8x32xf32>
    %153 = tpu.matmul %150, %152, %cst_50 {dimension_numbers = #tpu.dot_dimension_numbers<[1], [0], [0], [1], [0, 0, 1, 1], [], []>} : vector<8x32xbf16>, vector<32x32xbf16>, vector<8x32xf32> -> vector<8x32xf32>
    %c0_51 = arith.constant 0 : index
    %c0_52 = arith.constant 0 : index
    %c0_53 = arith.constant 0 : index
    %154 = vector.load %arg12[%c0_51, %c0_52, %c0_53] : memref<1x1x32xf32, #tpu.memory_space<vmem>>, vector<1x1x32xf32>
    %155 = vector.shape_cast %154 : vector<1x1x32xf32> to vector<1x32xf32>
    %156 = vector.broadcast %155 : vector<1x32xf32> to vector<8x32xf32>
    %157 = arith.addf %153, %156 : vector<8x32xf32>
    %158 = arith.addf %3, %157 : vector<8x32xf32>
    %c0_54 = arith.constant 0 : index
    %c0_55 = arith.constant 0 : index
    %c0_56 = arith.constant 0 : index
    %159 = vector.load %arg13[%c0_54, %c0_55, %c0_56] : memref<1x1x32xf32, #tpu.memory_space<vmem>>, vector<1x1x32xf32>
    %160 = vector.shape_cast %159 : vector<1x1x32xf32> to vector<1x32xf32>
    %c0_57 = arith.constant 0 : index
    %c0_58 = arith.constant 0 : index
    %c0_59 = arith.constant 0 : index
    %161 = vector.load %arg14[%c0_57, %c0_58, %c0_59] : memref<1x1x32xf32, #tpu.memory_space<vmem>>, vector<1x1x32xf32>
    %162 = vector.shape_cast %161 : vector<1x1x32xf32> to vector<1x32xf32>
    %cst_60 = arith.constant dense<0.000000e+00> : vector<8xf32>
    %163 = vector.multi_reduction <add>, %158, %cst_60 [1] : vector<8x32xf32> to vector<8xf32>
    %164 = vector.shape_cast %163 : vector<8xf32> to vector<8x1xf32>
    %cst_61 = arith.constant 3.200000e+01 : f32
    %165 = vector.broadcast %cst_61 : f32 to vector<8x1xf32>
    %166 = arith.divf %164, %165 : vector<8x1xf32>
    %167 = vector.broadcast %166 : vector<8x1xf32> to vector<8x32xf32>
    %168 = arith.subf %158, %167 : vector<8x32xf32>
    %169 = arith.mulf %168, %168 : vector<8x32xf32>
    %cst_62 = arith.constant dense<0.000000e+00> : vector<8xf32>
    %170 = vector.multi_reduction <add>, %169, %cst_62 [1] : vector<8x32xf32> to vector<8xf32>
    %171 = vector.shape_cast %170 : vector<8xf32> to vector<8x1xf32>
    %cst_63 = arith.constant 3.100000e+01 : f32
    %172 = vector.broadcast %cst_63 : f32 to vector<8x1xf32>
    %173 = arith.divf %171, %172 : vector<8x1xf32>
    %174 = vector.broadcast %166 : vector<8x1xf32> to vector<8x32xf32>
    %175 = arith.subf %158, %174 : vector<8x32xf32>
    %176 = vector.broadcast %160 : vector<1x32xf32> to vector<8x32xf32>
    %177 = arith.mulf %176, %175 : vector<8x32xf32>
    %178 = math.sqrt %173 : vector<8x1xf32>
    %cst_64 = arith.constant 9.99999997E-7 : f32
    %179 = vector.broadcast %cst_64 : f32 to vector<8x1xf32>
    %180 = arith.addf %178, %179 : vector<8x1xf32>
    %181 = vector.broadcast %180 : vector<8x1xf32> to vector<8x32xf32>
    %182 = arith.divf %177, %181 : vector<8x32xf32>
    %183 = vector.broadcast %162 : vector<1x32xf32> to vector<8x32xf32>
    %184 = arith.addf %182, %183 : vector<8x32xf32>
    %185 = arith.truncf %184 : vector<8x32xf32> to vector<8x32xbf16>
    %c0_65 = arith.constant 0 : index
    %c0_66 = arith.constant 0 : index
    %c0_67 = arith.constant 0 : index
    %186 = vector.load %arg15[%c0_65, %c0_66, %c0_67] : memref<1x32x64xbf16, #tpu.memory_space<vmem>>, vector<1x32x64xbf16>
    %187 = vector.shape_cast %186 : vector<1x32x64xbf16> to vector<32x64xbf16>
    %cst_68 = arith.constant dense<0.000000e+00> : vector<8x64xf32>
    %188 = tpu.matmul %185, %187, %cst_68 {dimension_numbers = #tpu.dot_dimension_numbers<[1], [0], [0], [1], [0, 0, 1, 1], [], []>} : vector<8x32xbf16>, vector<32x64xbf16>, vector<8x64xf32> -> vector<8x64xf32>
    %c0_69 = arith.constant 0 : index
    %c0_70 = arith.constant 0 : index
    %c0_71 = arith.constant 0 : index
    %189 = vector.load %arg16[%c0_69, %c0_70, %c0_71] : memref<1x1x64xf32, #tpu.memory_space<vmem>>, vector<1x1x64xf32>
    %190 = vector.shape_cast %189 : vector<1x1x64xf32> to vector<1x64xf32>
    %191 = vector.broadcast %190 : vector<1x64xf32> to vector<8x64xf32>
    %192 = arith.addf %188, %191 : vector<8x64xf32>
    %cst_72 = arith.constant 5.000000e-01 : f32
    %193 = vector.broadcast %cst_72 : f32 to vector<8x64xf32>
    %194 = arith.mulf %193, %192 : vector<8x64xf32>
    %195 = arith.mulf %192, %192 : vector<8x64xf32>
    %196 = arith.mulf %192, %195 : vector<8x64xf32>
    %cst_73 = arith.constant 4.471500e-02 : f32
    %197 = vector.broadcast %cst_73 : f32 to vector<8x64xf32>
    %198 = arith.mulf %197, %196 : vector<8x64xf32>
    %199 = arith.addf %192, %198 : vector<8x64xf32>
    %cst_74 = arith.constant 0.797884583 : f32
    %200 = vector.broadcast %cst_74 : f32 to vector<8x64xf32>
    %201 = arith.mulf %200, %199 : vector<8x64xf32>
    %202 = math.tanh %201 : vector<8x64xf32>
    %cst_75 = arith.constant 1.000000e+00 : f32
    %203 = vector.broadcast %cst_75 : f32 to vector<8x64xf32>
    %204 = arith.addf %203, %202 : vector<8x64xf32>
    %205 = arith.mulf %194, %204 : vector<8x64xf32>
    %206 = arith.truncf %205 : vector<8x64xf32> to vector<8x64xbf16>
    %c0_76 = arith.constant 0 : index
    %c0_77 = arith.constant 0 : index
    %c0_78 = arith.constant 0 : index
    %207 = vector.load %arg17[%c0_76, %c0_77, %c0_78] : memref<1x64x32xbf16, #tpu.memory_space<vmem>>, vector<1x64x32xbf16>
    %208 = vector.shape_cast %207 : vector<1x64x32xbf16> to vector<64x32xbf16>
    %cst_79 = arith.constant dense<0.000000e+00> : vector<8x32xf32>
    %209 = tpu.matmul %206, %208, %cst_79 {dimension_numbers = #tpu.dot_dimension_numbers<[1], [0], [0], [1], [0, 0, 1, 1], [], []>} : vector<8x64xbf16>, vector<64x32xbf16>, vector<8x32xf32> -> vector<8x32xf32>
    %c0_80 = arith.constant 0 : index
    %c0_81 = arith.constant 0 : index
    %c0_82 = arith.constant 0 : index
    %210 = vector.load %arg18[%c0_80, %c0_81, %c0_82] : memref<1x1x32xf32, #tpu.memory_space<vmem>>, vector<1x1x32xf32>
    %211 = vector.shape_cast %210 : vector<1x1x32xf32> to vector<1x32xf32>
    %212 = vector.broadcast %211 : vector<1x32xf32> to vector<8x32xf32>
    %213 = arith.addf %209, %212 : vector<8x32xf32>
    %214 = arith.addf %158, %213 : vector<8x32xf32>
    %c0_83 = arith.constant 0 : index
    %c0_84 = arith.constant 0 : index
    %215 = vector.load %arg22[%c0_83, %c0_84] : memref<8x32xf32, #tpu.memory_space<vmem>>, vector<8x32xf32>
    tpu.vector_store %arg22[%c0_83, %c0_84], %214 {strides = array<i32>} : memref<8x32xf32, #tpu.memory_space<vmem>>, vector<8x32xf32>,
    %c1_i32_85 = arith.constant 1 : i32
    %216 = arith.cmpi eq, %arg1, %c1_i32_85 : i32
    %217 = arith.extui %216 : i1 to i32
    %c0_i32_86 = arith.constant 0 : i32
    %218 = arith.cmpi ne, %217, %c0_i32_86 : i32
    scf.if %218 {
      %c0_87 = arith.constant 0 : index
      %c0_88 = arith.constant 0 : index
      %219 = vector.load %arg19[%c0_87, %c0_88] : memref<1x32xf32, #tpu.memory_space<vmem>>, vector<1x32xf32>
      %c0_89 = arith.constant 0 : index
      %c0_90 = arith.constant 0 : index
      %220 = vector.load %arg20[%c0_89, %c0_90] : memref<1x32xf32, #tpu.memory_space<vmem>>, vector<1x32xf32>
      %cst_91 = arith.constant dense<0.000000e+00> : vector<8xf32>
      %221 = vector.multi_reduction <add>, %214, %cst_91 [1] : vector<8x32xf32> to vector<8xf32>
      %222 = vector.shape_cast %221 : vector<8xf32> to vector<8x1xf32>
      %cst_92 = arith.constant 3.200000e+01 : f32
      %223 = vector.broadcast %cst_92 : f32 to vector<8x1xf32>
      %224 = arith.divf %222, %223 : vector<8x1xf32>
      %225 = vector.broadcast %224 : vector<8x1xf32> to vector<8x32xf32>
      %226 = arith.subf %214, %225 : vector<8x32xf32>
      %227 = arith.mulf %226, %226 : vector<8x32xf32>
      %cst_93 = arith.constant dense<0.000000e+00> : vector<8xf32>
      %228 = vector.multi_reduction <add>, %227, %cst_93 [1] : vector<8x32xf32> to vector<8xf32>
      %229 = vector.shape_cast %228 : vector<8xf32> to vector<8x1xf32>
      %cst_94 = arith.constant 3.100000e+01 : f32
      %230 = vector.broadcast %cst_94 : f32 to vector<8x1xf32>
      %231 = arith.divf %229, %230 : vector<8x1xf32>
      %232 = vector.broadcast %224 : vector<8x1xf32> to vector<8x32xf32>
      %233 = arith.subf %214, %232 : vector<8x32xf32>
      %234 = vector.broadcast %219 : vector<1x32xf32> to vector<8x32xf32>
      %235 = arith.mulf %234, %233 : vector<8x32xf32>
      %236 = math.sqrt %231 : vector<8x1xf32>
      %cst_95 = arith.constant 9.99999997E-7 : f32
      %237 = vector.broadcast %cst_95 : f32 to vector<8x1xf32>
      %238 = arith.addf %236, %237 : vector<8x1xf32>
      %239 = vector.broadcast %238 : vector<8x1xf32> to vector<8x32xf32>
      %240 = arith.divf %235, %239 : vector<8x32xf32>
      %241 = vector.broadcast %220 : vector<1x32xf32> to vector<8x32xf32>
      %242 = arith.addf %240, %241 : vector<8x32xf32>
      %c0_96 = arith.constant 0 : index
      %c0_97 = arith.constant 0 : index
      %c0_98 = arith.constant 0 : index
      %243 = vector.load %arg21[%c0_96, %c0_97, %c0_98] : memref<1x8x32xf32, #tpu.memory_space<vmem>>, vector<1x8x32xf32>
      %244 = vector.shape_cast %243 : vector<1x8x32xf32> to vector<8x32xf32>
      %245 = vector.shape_cast %242 : vector<8x32xf32> to vector<1x8x32xf32>
      tpu.vector_store %arg21[%c0_96, %c0_97, %c0_98], %245 {strides = array<i32>} : memref<1x8x32xf32, #tpu.memory_space<vmem>>, vector<1x8x32xf32>,
    } else {
    }
    return
  }
  func.func @transform_0(%arg0: i32, %arg1: i32) -> (i32, i32, i32) {
    %c0_i32 = arith.constant 0 : i32
    %c0_i32_0 = arith.constant 0 : i32
    %c0_i32_1 = arith.constant 0 : i32
    return %arg0, %c0_i32, %c0_i32_0 : i32, i32, i32
  }
  func.func @transform_1(%arg0: i32, %arg1: i32) -> (i32, i32, i32) {
    %c0_i32 = arith.constant 0 : i32
    %c0_i32_0 = arith.constant 0 : i32
    %c0_i32_1 = arith.constant 0 : i32
    return %arg1, %c0_i32, %c0_i32_0 : i32, i32, i32
  }
  func.func @transform_2(%arg0: i32, %arg1: i32) -> (i32, i32, i32) {
    %c0_i32 = arith.constant 0 : i32
    %c0_i32_0 = arith.constant 0 : i32
    %c0_i32_1 = arith.constant 0 : i32
    return %arg1, %c0_i32, %c0_i32_0 : i32, i32, i32
  }
  func.func @transform_3(%arg0: i32, %arg1: i32) -> (i32, i32, i32) {
    %c0_i32 = arith.constant 0 : i32
    %c0_i32_0 = arith.constant 0 : i32
    %c0_i32_1 = arith.constant 0 : i32
    return %arg1, %c0_i32, %c0_i32_0 : i32, i32, i32
  }
  func.func @transform_4(%arg0: i32, %arg1: i32) -> (i32, i32, i32) {
    %c0_i32 = arith.constant 0 : i32
    %c0_i32_0 = arith.constant 0 : i32
    %c0_i32_1 = arith.constant 0 : i32
    return %arg1, %c0_i32, %c0_i32_0 : i32, i32, i32
  }
  func.func @transform_5(%arg0: i32, %arg1: i32) -> (i32, i32, i32) {
    %c0_i32 = arith.constant 0 : i32
    %c0_i32_0 = arith.constant 0 : i32
    %c0_i32_1 = arith.constant 0 : i32
    return %arg1, %c0_i32, %c0_i32_0 : i32, i32, i32
  }
  func.func @transform_6(%arg0: i32, %arg1: i32) -> (i32, i32, i32) {
    %c0_i32 = arith.constant 0 : i32
    %c0_i32_0 = arith.constant 0 : i32
    %c0_i32_1 = arith.constant 0 : i32
    return %arg1, %c0_i32, %c0_i32_0 : i32, i32, i32
  }
  func.func @transform_7(%arg0: i32, %arg1: i32) -> (i32, i32, i32) {
    %c0_i32 = arith.constant 0 : i32
    %c0_i32_0 = arith.constant 0 : i32
    %c0_i32_1 = arith.constant 0 : i32
    return %arg1, %c0_i32, %c0_i32_0 : i32, i32, i32
  }
  func.func @transform_8(%arg0: i32, %arg1: i32) -> (i32, i32, i32) {
    %c0_i32 = arith.constant 0 : i32
    %c0_i32_0 = arith.constant 0 : i32
    %c0_i32_1 = arith.constant 0 : i32
    return %arg1, %c0_i32, %c0_i32_0 : i32, i32, i32
  }
  func.func @transform_9(%arg0: i32, %arg1: i32) -> (i32, i32, i32) {
    %c0_i32 = arith.constant 0 : i32
    %c0_i32_0 = arith.constant 0 : i32
    %c0_i32_1 = arith.constant 0 : i32
    return %arg1, %c0_i32, %c0_i32_0 : i32, i32, i32
  }
  func.func @transform_10(%arg0: i32, %arg1: i32) -> (i32, i32, i32) {
    %c0_i32 = arith.constant 0 : i32
    %c0_i32_0 = arith.constant 0 : i32
    %c0_i32_1 = arith.constant 0 : i32
    return %arg1, %c0_i32, %c0_i32_0 : i32, i32, i32
  }
  func.func @transform_11(%arg0: i32, %arg1: i32) -> (i32, i32, i32) {
    %c0_i32 = arith.constant 0 : i32
    %c0_i32_0 = arith.constant 0 : i32
    %c0_i32_1 = arith.constant 0 : i32
    return %arg1, %c0_i32, %c0_i32_0 : i32, i32, i32
  }
  func.func @transform_12(%arg0: i32, %arg1: i32) -> (i32, i32, i32) {
    %c0_i32 = arith.constant 0 : i32
    %c0_i32_0 = arith.constant 0 : i32
    %c0_i32_1 = arith.constant 0 : i32
    return %arg1, %c0_i32, %c0_i32_0 : i32, i32, i32
  }
  func.func @transform_13(%arg0: i32, %arg1: i32) -> (i32, i32, i32) {
    %c0_i32 = arith.constant 0 : i32
    %c0_i32_0 = arith.constant 0 : i32
    %c0_i32_1 = arith.constant 0 : i32
    return %arg1, %c0_i32, %c0_i32_0 : i32, i32, i32
  }
  func.func @transform_14(%arg0: i32, %arg1: i32) -> (i32, i32, i32) {
    %c0_i32 = arith.constant 0 : i32
    %c0_i32_0 = arith.constant 0 : i32
    %c0_i32_1 = arith.constant 0 : i32
    return %arg1, %c0_i32, %c0_i32_0 : i32, i32, i32
  }
  func.func @transform_15(%arg0: i32, %arg1: i32) -> (i32, i32, i32) {
    %c0_i32 = arith.constant 0 : i32
    %c0_i32_0 = arith.constant 0 : i32
    %c0_i32_1 = arith.constant 0 : i32
    return %arg1, %c0_i32, %c0_i32_0 : i32, i32, i32
  }
  func.func @transform_16(%arg0: i32, %arg1: i32) -> (i32, i32, i32) {
    %c0_i32 = arith.constant 0 : i32
    %c0_i32_0 = arith.constant 0 : i32
    %c0_i32_1 = arith.constant 0 : i32
    return %arg1, %c0_i32, %c0_i32_0 : i32, i32, i32
  }
  func.func @transform_17(%arg0: i32, %arg1: i32) -> (i32, i32) {
    %c0_i32 = arith.constant 0 : i32
    %c0_i32_0 = arith.constant 0 : i32
    %c0_i32_1 = arith.constant 0 : i32
    return %c0_i32, %c0_i32_0 : i32, i32
  }
  func.func @transform_18(%arg0: i32, %arg1: i32) -> (i32, i32) {
    %c0_i32 = arith.constant 0 : i32
    %c0_i32_0 = arith.constant 0 : i32
    %c0_i32_1 = arith.constant 0 : i32
    return %c0_i32, %c0_i32_0 : i32, i32
  }
  func.func @transform_19(%arg0: i32, %arg1: i32) -> (i32, i32, i32) {
    %c0_i32 = arith.constant 0 : i32
    %c0_i32_0 = arith.constant 0 : i32
    %c0_i32_1 = arith.constant 0 : i32
    return %arg0, %c0_i32, %c0_i32_0 : i32, i32, i32
  }
}

</mosaic_0001>

<bundles_post_ra>
// kernel: tpu_custom_call.1
= control target key start
LH: loop header
LB: loop body
LE: loop exit
PB: predicated region body
PF: predicated region fallthrough
CT: control target
= control target key end

     0   :  { %s4153_s0 = inlined_call_operand.hbm [shape: f32[2,8,32], index: 0, kind: input, shape index: {}]   ;;  %s4154_s1 = inlined_call_operand.vmem [shape: f32[2,1,32], index: 1, kind: input, shape index: {}]   ;;  %s4155_s2 = inlined_call_operand.vmem [shape: f32[2,1,32], index: 2, kind: input, shape index: {}]   ;;  %s4156_s3 = inlined_call_operand.vmem [shape: bf16[2,32,32], index: 3, kind: input, shape index: {}]   ;;  %s4157_s4 = inlined_call_operand.vmem [shape: f32[2,1,32], index: 4, kind: input, shape index: {}]   ;;  %s4158_s5 = inlined_call_operand.vmem [shape: bf16[2,32,32], index: 5, kind: input, shape index: {}]   ;;  %s4159_s6 = inlined_call_operand.vmem [shape: f32[2,1,32], index: 6, kind: input, shape index: {}]   ;;  %s4160_s7 = inlined_call_operand.vmem [shape: bf16[2,32,32], index: 7, kind: input, shape index: {}]   ;;  %s4161_s8 = inlined_call_operand.vmem [shape: f32[2,1,32], index: 8, kind: input, shape index: {}]   ;;  %s4162_s9 = inlined_call_operand.hbm [shape: bf16[2,32,32], index: 9, kind: input, shape index: {}]   ;;  %s4163_s10 = inlined_call_operand.vmem [shape: f32[2,1,32], index: 10, kind: input, shape index: {}]   ;;  %s4164_s11 = inlined_call_operand.vmem [shape: f32[2,1,32], index: 11, kind: input, shape index: {}]   ;;  %s4165_s12 = inlined_call_operand.vmem [shape: f32[2,1,32], index: 12, kind: input, shape index: {}]   ;;  %s4166_s13 = inlined_call_operand.hbm [shape: bf16[2,32,64], index: 13, kind: input, shape index: {}]   ;;  %s4167_s14 = inlined_call_operand.vmem [shape: f32[2,1,64], index: 14, kind: input, shape index: {}]   ;;  %s4168_s15 = inlined_call_operand.vmem [shape: bf16[2,64,32], index: 15, kind: input, shape index: {}]   ;;  %s4169_s16 = inlined_call_operand.vmem [shape: f32[2,1,32], index: 16, kind: input, shape index: {}]   ;;  %s4170_s17 = inlined_call_operand.vmem [shape: f32[1,32], index: 17, kind: input, shape index: {}]   ;;  %s4171_s18 = inlined_call_operand.vmem [shape: f32[1,32], index: 18, kind: input, shape index: {}]   ;;  %s4172_s19 = inlined_call_operand.hbm [shape: f32[2,8,32], index: 19, kind: output, shape index: {}]  }
   0x1   :  { %4200 = sst [smem:[#allocation28_spill]] %s4153_s0 }
   0x2   :  { %4201 = sst [smem:[#allocation29_spill]] %s4154_s1 }
   0x3   :  { %4202 = sst [smem:[#allocation30_spill]] %s4155_s2 }
   0x4   :  { %4203 = sst [smem:[#allocation31_spill]] %s4156_s3 }
   0x5   :  { %4204 = sst [smem:[#allocation32_spill]] %s4158_s5 }
   0x6   :  { %4205 = sst [smem:[#allocation33_spill]] %s4159_s6 }
   0x7   :  { %4206 = sst [smem:[#allocation34_spill]] %s4160_s7 }
   0x8   :  { %4207 = sst [smem:[#allocation35_spill]] %s4161_s8 }
   0x9   :  { %4208 = sst [smem:[#allocation36_spill]] %s4162_s9 }
   0xa   :  { %4209 = sst [smem:[#allocation37_spill]] %s4163_s10 }
   0xb   :  { %4210 = sst [smem:[#allocation38_spill]] %s4164_s11 }
   0xc   :  { %4211 = sst [smem:[#allocation39_spill]] %s4165_s12 }
   0xd   :  { %4212 = sst [smem:[#allocation40_spill]] %s4166_s13 }
   0xe   :  { %4213 = sst [smem:[#allocation41_spill]] %s4167_s14 }
   0xf   :  { %4214 = sst [smem:[#allocation42_spill]] %s4168_s15 }
  0x10   :  { %4215 = sst [smem:[#allocation43_spill]] %s4169_s16 }
  0x11   :  { %4216 = sst [smem:[#allocation44_spill]] %s4170_s17 }
  0x12   :  { %4217 = sst [smem:[#allocation45_spill]] %s4171_s18 }
  0x13   :  { %4218 = sst [smem:[#allocation46_spill]] %s4172_s19 }
  0x14   :  { %24 = vsyncpa [#allocation4], 0 }
  0x15   :  { %26 = vsyncpa [#allocation4 + $0x1], 0 }
  0x16   :  { %27 = vsyncpa [#allocation7], 0 }
  0x17   :  { %29 = vsyncpa [#allocation7 + $0x1], 0 }
  0x18   :  { %30 = vsyncpa [#allocation5], 0 }
  0x19   :  { %32 = vsyncpa [#allocation5 + $0x1], 0  ;;  %s3497_s0 = smov 0   ;;  %s3499_s30 = smov 0  }
  0x1a   :  { %s3501_s20 = smov 0   ;;  %s3503_s21 = smov 0  }
  0x1b   :  { %s3505_s1 = smov 0   ;;  %s3507_s22 = smov 0  }
  0x1c   :  { %s3509_s2 = smov 0   ;;  %s3511_s23 = smov 0  }
  0x1d   :  { %s3513_s24 = smov 0   ;;  %s3515_s25 = smov 0  }
  0x1e   :  { %s3517_s3 = smov 0  }
  0x1f LB: > { %4219 = sst [smem:[#allocation13_spill]] %s3344_s30  ;;  %s47_s26 = sadd.s32 1, %s3372_s24  ;;  %s3380_s3 = sphi %s3517_s3, %s38_s3   ;;  %s3376_s25 = sphi %s3515_s25, %s4305_s25   ;;  %s3372_s24 = sphi %s3513_s24, %s4304_s24   ;;  %s3368_s23 = sphi %s3511_s23, %s4303_s23   ;;  %s3364_s2 = sphi %s3509_s2, %s4302_s2   ;;  %s3360_s22 = sphi %s3507_s22, %s4301_s22   ;;  %s3356_s1 = sphi %s3505_s1, %s4300_s1   ;;  %s3352_s21 = sphi %s3503_s21, %s4299_s21   ;;  %s3348_s20 = sphi %s3501_s20, %s4298_s20   ;;  %s3344_s30 = sphi %s3499_s30, %s4297_s30   ;;  %s3340_s0 = sphi %s3497_s0, %s4296_s0  }
  0x20   : > { %4220 = sst [smem:[#allocation14_spill]] %s3348_s20  ;;  %p4179_p0 = scmp.eq.s32.totalorder %s3380_s3, 0 }
  0x21   : > { %4221 = sst [smem:[#allocation15_spill]] %s3352_s21  ;;  %p3554_p1 = scmp.ge.s32.totalorder %s47_s26, 2 }
  0x22   : > { %4222 = sst [smem:[#allocation16_spill]] %s3356_s1  ;;  %s291_s28 = sadd.s32 1, %s3348_s20 }
  0x23   : > { %4223 = sst [smem:[#allocation17_spill]] %s3360_s22  ;;  %p298_p2 = scmp.ne.s32.totalorder %s3348_s20, %s3344_s30 }
  0x24   : > { %4224 = sst [smem:[#allocation18_spill]] %s3368_s23  ;;  %s4307_s26 = smov (%p3554_p1, %s47_s26), 0 }
  0x25   : > { %4225 = sst [smem:[#allocation19_spill]] %s3372_s24  ;;  %p300_p3 = por %p298_p2, %p4179_p0 }
  0x26   : > { %4226 = sst [smem:[#allocation20_spill]] %s3376_s25  ;;  %s288_s29 = ssub.s32 %s3372_s24, %s4307_s26 }
  0x27   : > { %4227 = sst [smem:[#allocation21_spill]] %s3380_s3  ;;  %p4178_p4 = scmp.lt.s32.totalorder %s3380_s3, 4 }
  0x28   : > { %4229 = sst [smem:[#allocation22_spill]] %s4307_s26  ;;  %p289_p5 = scmp.eq.s32.totalorder %s288_s29, 0 }
  0x29   : > { %s656_s19 = sand.u32 1, %s3380_s3   ;;  %s658_s23 = sand.u32 1, %s3348_s20  }
  0x2a   : > { %s3573_s18 = scalar_select %p289_p5, %s3348_s20, %s291_s28  }
  0x2b   : > { %s3575_s17 = sshll.u32 %s658_s23, 4  ;;  %s4176_s16 = sshll.u32 %s3372_s24, 8 }
  0x2c   : > { %4230 = sst [smem:[#allocation23_spill]] %s3573_s18  ;;  %s4231_s9 = sld [smem:[#allocation36_spill]] }
  0x2d   : > { %s660_s26 = scalar_lea.vmem [#allocation6], %s3575_s17  ;;  %p3588_p6 = pnand %p4178_p4, %p300_p3 }
  0x2e   : > { %s667_s29 = sshll.u32 %s660_s26, 4  ;;  %s3594_s23 = scalar_lea.sflag [#allocation7], %s656_s19  ;;  %s3592_s29 = int_to_ptr.vmem [resolvable:$true] %s667_s29 }
  0x2f   : > { %p4180_p8 = pneg %p3588_p6 }
  0x32   : > { %s3583_s12 = scalar_lea.hbm %s4231_s9, %s4176_s16  ;;  %s3169_s16 = scalar_lea.hbm %s4231_s9, 512 }
  0x33   : > { %s3164_s14 = scalar_lea.hbm %s3583_s12, 256  ;;  %p3170_p11 = scmp.lt.u32.totalorder %s3583_s12, %s4231_s9 }
  0x34   : > { %p3165_p7 = scmp.ne.s32.totalorder %s3583_s12, %s3164_s14  ;;  %p3171_p12 = scmp.lt.u32.totalorder %s3169_s16, %s3164_s14 }
  0x35   : > { %p3173_p2 = scmp.lt.u32.totalorder %s3164_s14, %s3583_s12 }
  0x36   : > { %p3167_p9 = pnand %p4180_p8, %p3165_p7  ;;  %p3172_p13 = por %p3171_p12, %p3170_p11 }
  0x38   : > { %p3168_p10 = pneg %p3167_p9  ;;  %p3174_p3 = por %p3173_p2, %p3172_p13 }
  0x3a   : > { %p3175_p5 = pnand %p3174_p3, %p3168_p10 }
  0x3c   : > { %3178 = shalt.err (!%p3175_p5)
}
  0x3d   : > { %s3179_s19 = scalar_lea.vmem %s3592_s29, 256  ;;  %s3382_s15 = smov [#allocation6]  }
  0x3e   : > { %p3180_p7 = scmp.ne.s32.totalorder %s3592_s29, %s3179_s19  ;;  %s3184_s26 = sshll.u32 %s3382_s15, 4  ;;  %s3185_s26 = int_to_ptr.vmem [resolvable:$false] %s3184_s26 }
  0x3f   : > { %s3186_s18 = scalar_lea.vmem %s3185_s26, 512  ;;  %p3187_p0 = scmp.lt.s32.totalorder %s3592_s29, %s3185_s26 }
  0x40   : > { %p3182_p9 = pnand %p3180_p7, %p4180_p8  ;;  %p3188_p11 = scmp.lt.s32.totalorder %s3186_s18, %s3179_s19 }
  0x42   : > { %p3183_p4 = pneg %p3182_p9  ;;  %p3189_p12 = por %p3188_p11, %p3187_p0 }
  0x44   : > { %p3190_p13 = pnand %p3189_p12, %p3183_p4 }
  0x46   : > { %3193 = shalt.err (!%p3190_p13)
}
  0x47   : > { %s4181_s16 = smov 64   ;;  %s4182_s20 = smov 4  }
  0x48   : > { %2997 = dma.hbm_to_vmem [thread:$0]  (!%p3588_p6), %s3583_s12, 256, %s3592_s29, %s3594_s23, %s4181_s16, %s4181_s16, %s4182_s20  }
  0x49   : > { %p304_p0 = scmp.ne.s32.totalorder %s3344_s30, %s3340_s0  ;;  %s4233_s14 = sshll.u32 %s3372_s24, 8 }
  0x4a   : > { %s4234_s13 = sld [smem:[#allocation40_spill]]  ;;  %p2686_p4 = scmp.ge.s32.totalorder %s3380_s3, 1 }
  0x4b   : > { %s699_s18 = scalar_lea.vmem [#allocation8], %s3575_s17  ;;  %p734_p10 = scmp.lt.s32.totalorder %s3380_s3, 5 }
  0x4c   : > { %s706_s9 = sshll.u32 %s699_s18, 4  ;;  %s3642_s12 = sadd.s32 4294967295, %s3380_s3   ;;  %s3709_s9 = int_to_ptr.vmem [resolvable:$true] %s706_s9 }
  0x4d   : > { %p3637_p2 = pnand %p2686_p4, %p734_p10  ;;  %s2675_s29 = sadd.s32 4294967294, %s3380_s3  }
  0x4e   : > { %s57_s17 = sadd.s32 1, %s3360_s22  ;;  %p64_p3 = scmp.ne.s32.totalorder %s3360_s22, %s3356_s1 }
  0x4f   : > { %s4235_s11 = scalar_select %p3637_p2, 1, 0 }
  0x50   : > { %s3632_s26 = scalar_lea.hbm %s4234_s13, %s4233_s14  ;;  %s50_s14 = sadd.s32 1, %s3376_s25 }
  0x51   : > { %s4309_s14 = smov (!%p3554_p1, %s50_s14), %s3376_s25  ;;  %p70_p7 = scmp.ne.s32.totalorder %s3356_s1, %s3352_s21 }
  0x52   : > { %p52_p5 = scmp.ge.s32.totalorder %s4309_s14, 2  ;;  %p4236_p9 = scmp.eq.s32.totalorder %s3380_s3, 0 }
  0x53   : > { %p71_p12 = scmp.eq.s32.totalorder %s3642_s12, 0  ;;  %p552_p4 = scmp.eq.s32.totalorder %s3642_s12, 3 }
  0x54   : > { %p3656_p11 = por %p4236_p9, %p64_p3  ;;  %s4311_s14 = smov (%p52_p5, %s4309_s14), 0 }
  0x55   : > { %4238 = sst [smem:[#allocation24_spill]] %s4311_s14  ;;  %p3666_p1 = por %p71_p12, %p70_p7 }
  0x56   : > { %p3673_p13 = por %p304_p0, %p71_p12  ;;  %s54_s18 = ssub.s32 %s3376_s25, %s4311_s14 }
  0x57   : > { %s4239_s27 = scalar_select %p3666_p1, 1, 0 }
  0x58   : > { %s4240_s15 = scalar_select %p3673_p13, 1, 0 }
  0x59   : > { %p55_p10 = scmp.eq.s32.totalorder %s54_s18, 0  ;;  %p558_p9 = scmp.eq.s32.totalorder %s2675_s29, 3 }
  0x5a   : > { %p3680_p8 = por %p552_p4, %p64_p3  ;;  %s584_s20 = sand.u32 1, %s3360_s22  }
  0x5b   : > { %s3686_s24 = scalar_select %p55_p10, %s3360_s22, %s57_s17  }
  0x5c   : > { %s4241_s16 = scalar_select %p3680_p8, 1, 0 }
  0x5d   : > { %4243 = sst [smem:[#allocation26_spill]] %s3686_s24  ;;  %p3691_p5 = por %p558_p9, %p70_p7 }
  0x5e   : > { %4242 = sst [smem:[#allocation25_spill]] %s4241_s16  ;;  %s2678_s0 = sshll.u32 %s584_s20, 3 }
  0x5f   : > { %s4244_s10 = scalar_select %p3691_p5, 1, 0 }
  0x60   : > { %s2679_s8 = sshll.u32 %s3376_s25, 7  ;;  %s4246_s14 = sld [smem:[#allocation28_spill]] }
  0x61   : > { %4245 = sst [smem:[#allocation27_spill]] %s4244_s10  ;;  %s588_s29 = scalar_lea.vmem [#allocation3], %s2678_s0 }
  0x62   : > { %s595_s18 = sshll.u32 %s588_s29, 4  ;;  %p4247_p0 = scmp.lt.s32.totalorder %s3380_s3, 4  ;;  %s3711_s18 = int_to_ptr.vmem [resolvable:$true] %s595_s18 }
  0x63   : > { %s585_s6 = scalar_lea.sflag [#allocation4], %s584_s20 }
  0x64   : > { %p3705_p3 = pnand %p4247_p0, %p3656_p11 }
  0x66   : > { %s3699_s5 = scalar_lea.hbm %s4246_s14, %s2679_s8  ;;  %p3196_p12 = pneg %p3705_p3 }
  0x67   : > { %s3194_s7 = scalar_lea.hbm %s3699_s5, 128  ;;  %s3199_s0 = scalar_lea.hbm %s4246_s14, 256 }
  0x68   : > { %p3195_p7 = scmp.ne.s32.totalorder %s3699_s5, %s3194_s7  ;;  %p3200_p11 = scmp.lt.u32.totalorder %s3699_s5, %s4246_s14 }
  0x69   : > { %p3201_p9 = scmp.lt.u32.totalorder %s3199_s0, %s3194_s7  ;;  %p3203_p5 = scmp.lt.u32.totalorder %s3194_s7, %s3699_s5 }
  0x6a   : > { %p3197_p4 = pnand %p3196_p12, %p3195_p7 }
  0x6b   : > { %p3202_p0 = por %p3201_p9, %p3200_p11 }
  0x6c   : > { %p3198_p10 = pneg %p3197_p4 }
  0x6d   : > { %p3204_p8 = por %p3203_p5, %p3202_p0 }
  0x6f   : > { %p3205_p13 = pnand %p3204_p8, %p3198_p10 }
  0x71   : > { %3208 = shalt.err (!%p3205_p13)
}
  0x72   : > { %s3209_s20 = scalar_lea.vmem %s3711_s18, 128  ;;  %s3385_s8 = smov [#allocation3]  }
  0x73   : > { %p3210_p7 = scmp.ne.s32.totalorder %s3711_s18, %s3209_s20  ;;  %s3214_s19 = sshll.u32 %s3385_s8, 4  ;;  %s3215_s19 = int_to_ptr.vmem [resolvable:$false] %s3214_s19 }
  0x74   : > { %s3216_s25 = scalar_lea.vmem %s3215_s19, 256  ;;  %p3217_p2 = scmp.lt.s32.totalorder %s3711_s18, %s3215_s19 }
  0x75   : > { %p3212_p4 = pnand %p3210_p7, %p3196_p12  ;;  %p3218_p11 = scmp.lt.s32.totalorder %s3216_s25, %s3209_s20 }
  0x77   : > { %p3213_p1 = pneg %p3212_p4  ;;  %p3219_p9 = por %p3218_p11, %p3217_p2 }
  0x79   : > { %p3220_p5 = pnand %p3219_p9, %p3213_p1 }
  0x7b   : > { %3223 = shalt.err (!%p3220_p5)
}
  0x7c   : > { %2994 = dma.hbm_to_vmem [thread:$0]  (!%p3705_p3), %s3699_s5, 128, %s3711_s18, %s585_s6  }
  0x7d   : > { %s3224_s7 = scalar_lea.hbm %s3632_s26, 256  ;;  %p4249_p13 = pneg %p3588_p6 }
  0x7e   : > { %p3225_p8 = scmp.ne.s32.totalorder %s3632_s26, %s3224_s7  ;;  %s3229_s20 = scalar_lea.hbm %s4234_s13, 512 }
  0x7f   : > { %p3230_p2 = scmp.lt.u32.totalorder %s3632_s26, %s4234_s13  ;;  %p3231_p1 = scmp.lt.u32.totalorder %s3229_s20, %s3224_s7 }
  0x80   : > { %p3227_p12 = pnand %p3225_p8, %p4249_p13  ;;  %p3233_p7 = scmp.lt.u32.totalorder %s3224_s7, %s3632_s26 }
  0x81   : > { %p3232_p0 = por %p3231_p1, %p3230_p2 }
  0x82   : > { %p3228_p10 = pneg %p3227_p12 }
  0x83   : > { %p3234_p4 = por %p3233_p7, %p3232_p0 }
  0x85   : > { %p3235_p11 = pnand %p3234_p4, %p3228_p10 }
  0x87   : > { %3238 = shalt.err (!%p3235_p11)
}
  0x88   : > { %s3239_s5 = scalar_lea.vmem %s3709_s9, 256  ;;  %p4250_p9 = pmov %p4249_p13 }
  0x89   : > { %p3240_p3 = scmp.ne.s32.totalorder %s3709_s9, %s3239_s5  ;;  %s3386_s18 = smov [#allocation8]  }
  0x8a   : > { %s3244_s6 = sshll.u32 %s3386_s18, 4  ;;  %s3245_s6 = int_to_ptr.vmem [resolvable:$false] %s3244_s6 }
  0x8b   : > { %p3242_p5 = pnand %p3240_p3, %p4250_p9  ;;  %s3246_s19 = scalar_lea.vmem %s3245_s6, 512 }
  0x8c   : > { %p3247_p13 = scmp.lt.s32.totalorder %s3709_s9, %s3245_s6  ;;  %p3248_p12 = scmp.lt.s32.totalorder %s3246_s19, %s3239_s5 }
  0x8d   : > { %p3243_p8 = pneg %p3242_p5 }
  0x8e   : > { %p3249_p2 = por %p3248_p12, %p3247_p13 }
  0x90   : > { %p3250_p1 = pnand %p3249_p2, %p3243_p8 }
  0x92   : > { %3253 = shalt.err (!%p3250_p1)
}
  0x93   : > { %s4251_s25 = smov 4   ;;  %s4252_s7 = smov 64  }
  0x94   : > { %3000 = dma.hbm_to_vmem [thread:$0]  (!%p3588_p6), %s3632_s26, 256, %s3709_s9, %s3594_s23, %s4252_s7, %s4252_s7, %s4251_s25  }
  0x95   : > { %p4253_p10 = scmp.ne.s32.totalorder %s4235_s11, 0 }
  0x96   : > { %s3768_s0 = sand.u32 (!%p4253_p10), 1, %s3356_s1   ;;  %p4254_p0 = scmp.ne.s32.totalorder (!%p4253_p10), %s4239_s27, 0 }
  0x97   : > { %738 = sbr.rel (%p4253_p10) target bundleno = 3476 (0xd94), region = 96  ;;  %s4189_s29 = sshll.u32 (!%p4253_p10), %s3768_s0, 3 }
  0x98   : > { %s741_s20 = scalar_lea.sflag (!%p4253_p10), [#allocation4], %s3768_s0  ;;  %s3774_s28 = scalar_lea.vmem (!%p4253_p10), [#allocation3], %s4189_s29 }
  0x9e   : > { %3327 = dma.done.wait (%p4254_p0), %s741_s20, 128  }
  0x9f   : > { %3329 = vsyncadd (%p4254_p0), %s741_s20, 4294967168  ;;  %s749_s9 = sand.u32 1, %s3642_s12   ;;  %s751_s11 = sand.u32 1, %s3344_s30  }
  0xa0   : > { %s3782_s23 = sshll.u32 %s751_s11, 4  ;;  %s750_s26 = scalar_lea.sflag [#allocation7], %s749_s9 }
  0xa1   : > { %p4255_p6 = scmp.ne.s32.totalorder %s4240_s15, 0 }
  0xa3   : > { %3331 = dma.done.wait (%p4255_p6), %s750_s26, 512  }
  0xa4   : > { %3333 = vsyncadd (%p4255_p6), %s750_s26, 4294966784  ;;  %p877_p7 = scmp.lt.s32.totalorder %s3364_s2, 1  ;;  %s4258_s5 = sld [smem:[#allocation31_spill]] }
  0xa5   : > { %s4259_s14 = sld [smem:[#allocation32_spill]]  ;;  %s4261_s22 = sld [smem:[#allocation34_spill]] }
  0xa6   : > { %s3791_s27 = scalar_select %p877_p7, %s3364_s2, 1 }
  0xa7   : > { %s4262_s11 = sld [smem:[#allocation35_spill]]  ;;  %s4264_s29 = sld [smem:[#allocation38_spill]] }
  0xa8   : > { %s2755_s7 = sshll.u32 %s3791_s27, 4  ;;  %s4265_s18 = sld [smem:[#allocation39_spill]] }
  0xa9   : > { %s762_s13 = scalar_lea.vmem [#allocation8], %s3782_s23  ;;  %p2699_p4 = scmp.ne.s32.totalorder %s3364_s2, 0 }
  0xaa   : > { %s3809_s8 = scalar_lea.vmem %s4258_s5, %s2755_s7  ;;  %s4268_s5 = sld [smem:[#allocation43_spill]]  ;;  %v932_v0 = vld [vmem:[%s3774_s28] sm:$0xff] (!%p2699_p4)  ;;  %vm933_vm0 = vcmask (!%p2699_p4), 261120  }
  0xab   : > { %s3814_s12 = scalar_lea.vmem %s4259_s14, %s2755_s7  ;;  %s3823_s1 = scalar_lea.vmem %s4261_s22, %s2755_s7  ;;  %934 = vst.msk [vmem:[#allocation2] sm:$0xff] (!%p2699_p4), %vm933_vm0, %v932_v0 }
  0xac   : > { %s4266_s22 = sld [smem:[#allocation41_spill]]  ;;  %s2758_s7 = sshll.u32 %s3791_s27, 5 }
  0xad   : > { %s906_s26 = scalar_lea.vmem %s4262_s11, %s3791_s27  ;;  %s912_s21 = scalar_lea.vmem %s4264_s29, %s3791_s27 }
  0xae   : > { %s915_s6 = scalar_lea.vmem %s4265_s18, %s3791_s27  ;;  %s4267_s11 = sld [smem:[#allocation42_spill]] }
  0xaf   : > { %s4269_s14 = sshll.u32 %s3768_s0, 3  ;;  %931 = sbr.rel (%p2699_p4) target bundleno = 182 (0xb6), region = 112 }
  0xb0   : > { %s926_s10 = scalar_lea.vmem %s4268_s5, %s3791_s27  ;;  %s3858_s29 = scalar_lea.vmem [#allocation9], %s4269_s14 }
  0xb2   : > { %s918_s25 = scalar_lea.vmem %s4266_s22, %s3791_s27 }
  0xb4   : > { %s3849_s9 = scalar_lea.vmem %s4267_s11, %s2758_s7 }
  0xb6 PF: > { %v3862_v1 = vld [vmem:[#allocation2] sm:$0xff]  ;;  %vm938_vm1 = vcmask 261120   ;;  %v3387_v10 = vmov 0.0   ;;  %v3122_v11 = vld [vmem:[%s3809_s8 + $0x8] sm:$0xff]   ;;  %vm3388_vm2 = vmmov 0   ;;  %s4270_s28 = sld [smem:[#allocation29_spill]]  ;;  %s4276_s17 = scalar_lea.vmem %s4157_s4, %s3791_s27 }
  0xb7   : > { %v939_v2 = vsel %vm938_vm1, %v3862_v1, 0.0  ;;  %v3120_v8 = vld [vmem:[%s3809_s8] sm:$0xff]   ;;  %2815 = vmatprep.subr.bf16.mxu0 %v3387_v10  ;;  %2823 = vmatprep.subr.bf16.mxu1 %v3387_v10  ;;  %v3123_v12 = vld [vmem:[%s3814_s12 + $0x8] sm:$0xff]   ;;  %s4272_s15 = sld [smem:[#allocation30_spill]]  ;;  %s4274_s7 = sld [smem:[#allocation33_spill]]  ;;  %vm1211_vm5 = vcmask 64512  }
  0xb8   : > { %940 = vadd.xlane.f32.xlu0 %v939_v2  ;;  %v3121_v9 = vld [vmem:[%s3814_s12] sm:$0xff]   ;;  %2816 = vmatpush3.bf16.msra.mxu0 %v3120_v8  ;;  %v3125_v29 = vld [vmem:[%s3823_s1 + $0x8] sm:$0xff]   ;;  %s3389_s30 = smov 112   ;;  %s3390_s5 = smov 120   ;;  %vm1456_vm6 = vcmask 1043456   ;;  %vm2087_vm12 = vcmask 130048  }
  0xb9   : > { %2824 = vmatpush3.bf16.msra.mxu1 %v3121_v9  ;;  %2817 = vmatprep.subr.bf16.mxu0 %v3387_v10  ;;  %v3124_v27 = vld [vmem:[%s3823_s1] sm:$0xff]   ;;  %s3391_s14 = smov 104   ;;  %s3393_s12 = smov 8   ;;  %vm2089_vm13 = vcmask 195584   ;;  %vm2311_vm0 = vcmask 523264  }
  0xba   : > { %2825 = vmatprep.subr.bf16.mxu1 %v3387_v10  ;;  %2819 = vmatprep.mubr.msk.bf16.mxu0 %vm3388_vm2, %v3387_v10  ;;  %v2702_v31 = vld [vmem:[%s4276_s17] ss:$0 sm:$0xff]  ;;  %s3394_s19 = smov 16   ;;  %s4280_s22 = sld [smem:[#allocation37_spill]] }
  0xbb   : > { %2827 = vmatprep.mubr.msk.bf16.mxu1 %vm3388_vm2, %v3387_v10  ;;  %v2710_v56 = vld [vmem:[%s906_s26] ss:$0 sm:$0xff]  ;;  %s4278_s26 = scalar_lea.vmem [#allocation6], %s3782_s23  ;;  %p2746_p11 = scmp.ne.s32.totalorder %s3364_s2, 1 }
  0xbc   : > { %2818 = vmatpush3.bf16.msra.mxu0 %v3122_v11  ;;  %s4271_s8 = scalar_lea.vmem %s4270_s28, %s3791_s27  ;;  %s4287_s16 = sld [smem:[#allocation45_spill]] (!%p2746_p11) }
  0xbd   : > { %2826 = vmatpush3.bf16.msra.mxu1 %v3123_v12  ;;  %2831 = vmatprep.subr.bf16.mxu0 %v3387_v10  ;;  %v2700_v21 = vld [vmem:[%s4271_s8] ss:$0 sm:$0xff]  ;;  %s4273_s18 = scalar_lea.vmem %s4272_s15, %s3791_s27  ;;  %s4275_s1 = scalar_lea.vmem %s4274_s7, %s3791_s27 }
  0xbe   : > { %2839 = vmatprep.subr.bf16.mxu1 %v3387_v10  ;;  %v2701_v24 = vld [vmem:[%s4273_s18] ss:$0 sm:$0xff]  ;;  %s4279_s8 = smov %s4278_s26  ;;  %s3395_s15 = smov 24  }
  0xbf   : > { %v2706_v30 = vld [vmem:[%s4275_s1] ss:$0 sm:$0xff] }
  0xc0   : > { %s4281_s7 = scalar_lea.vmem %s4280_s22, %s3791_s27  ;;  %s4286_s27 = sld [smem:[#allocation44_spill]] (!%p2746_p11) }
 0x145   : > { %v941_v3 = vpop.xlane.xlu0 %940 }
 0x146   : > { %v943_v4 = vmul.f32 0.03125, %v941_v3 }
 0x148   : > { %v944_v5 = vsub.f32 %v3862_v1, %v943_v4 }
 0x14a   : > { %v945_v6 = vmul.f32 %v944_v5, %v944_v5  ;;  %v957_v22 = vmul.f32 %v2700_v21, %v944_v5 }
 0x14c   : > { %v946_v7 = vsel %vm938_vm1, %v945_v6, 0.0  ;;  %v1396_v6 = vlaneseq }
 0x14d   : > { %947 = vadd.xlane.f32.xlu0 %v946_v7 }
 0x14e   : > { %v3952_v7 = vshrl.u32 %v1396_v6, 7  ;;  %v3954_v8 = vand.u32 127, %v1396_v6 }
 0x150   : > { %vm1400_vm7 = vcmp.ge.s32.totalorder %v3952_v7, %v3954_v8 }
 0x1da   : > { %v948_v13 = vpop.xlane.xlu0 %947 }
 0x1db   : > { %v950_v14 = vmul.f32 0.032258064, %v948_v13 }
 0x1dd   : > { %3134 = vrsqrt.f32 %v950_v14  ;;  %vm960_vm3 = vcmp.eq.f32.partialorder %v950_v14, inf  ;;  %v963_v17 = vand.u32 2147483648, %v950_v14  ;;  %vm962_vm4 = vcmp.eq.f32.partialorder %v950_v14, 0.0 }
 0x1e7   : > { %v3135_v15 = vpop.eup %3134 }
 0x1e8   : > { %v959_v16 = vmul.f32 %v3135_v15, %v950_v14 }
 0x1ea   : > { %v961_v18 = vsel %vm960_vm3, %v950_v14, %v959_v16 }
 0x1eb   : > { %v964_v19 = vsel %vm962_vm4, %v963_v17, %v961_v18 }
 0x1ec   : > { %v965_v20 = vadd.f32 1e-06, %v964_v19 }
 0x1ee   : > { %3136 = vrcp.f32 %v965_v20 }
 0x1f8   : > { %v3137_v23 = vpop.eup %3136 }
 0x1f9   : > { %v967_v25 = vmul.f32 %v3137_v23, %v957_v22 }
 0x1fb   : > { %v974_v26 = vadd.f32 %v2701_v24, %v967_v25 }
 0x1fd   : > { %v975_v28 = vpack.c.bf16 %v974_v26, %v974_v26 }
 0x1ff   : > { %2820 = vmatmul.mubr.msk.bf16.vlgmr.msra.gmra.mrb[0].mxu0 %vm938_vm1, %v975_v28  ;;  %2828 = vmatmul.mubr.msk.bf16.vlgmr.msra.gmra.mrb[0].mxu1 %vm938_vm1, %v975_v28 }
 0x200   : > { %2832 = vmatpush3.bf16.msra.mxu0 %v3124_v27  ;;  %2835 = vmatprep.mubr.msk.bf16.mxu0 %vm3388_vm2, %v3387_v10 }
 0x201   : > { %2833 = vmatprep.subr.bf16.mxu0 %v3387_v10  ;;  %2841 = vmatprep.mubr.msk.bf16.mxu1 %vm3388_vm2, %v3387_v10 }
 0x204   : > { %2834 = vmatpush3.bf16.msra.mxu0 %v3125_v29 }
 0x205   : > { %2845 = vmatprep.subr.bf16.mxu0 %v3387_v10 }
 0x207   : > { %2836 = vmatmul.mubr.msk.bf16.vlgmr.msra.gmra.mrb[4].mxu0 %vm938_vm1, %v975_v28 }
 0x208   : > { %2847 = vmatprep.mubr.msk.bf16.mxu0 %vm3388_vm2, %v3387_v10 }
 0x2d2   : > { %v1036_v32 = vpop.f32.mrb[0].mxu0  ;;  %v1099_v33 = vpop.f32.mrb[0].mxu1 }
 0x2d3   : > { %v1100_v34 = vadd.f32 %v2706_v30, %v1099_v33  ;;  %v2821_v35 = vpop.f32.mrb[1].mxu0  ;;  %v2829_v36 = vpop.f32.mrb[1].mxu1  ;;  %v1037_v39 = vadd.f32 %v2702_v31, %v1036_v32 }
 0x2d4   : > { %v1039_v37 = vpop.f32.mrb[2].mxu0  ;;  %v1102_v38 = vpop.f32.mrb[2].mxu1 }
 0x2d5   : > { %1187 = vrot.lane.b32.xlu0 %v1100_v34, %s3389_s30  ;;  %1184 = vrot.lane.b32.xlu1 %v1100_v34, %s3390_s5  ;;  %v2822_v40 = vpop.f32.mrb[3].mxu0  ;;  %v2830_v41 = vpop.f32.mrb[3].mxu1  ;;  %v1193_v42 = vpack.c.bf16 %v1100_v34, %v1100_v34  ;;  %v1168_v44 = vmul.f32 0.35355338, %v1037_v39 }
 0x2d7   : > { %v1216_v43 = vsel %vm1211_vm5, %v1193_v42, 0  ;;  %v1179_v48 = vpack.c.bf16 %v1168_v44, %v1168_v44 }
 0x2d8   : > { %2840 = vmatpush3.bf16.xpose.msra.mxu1 %v1216_v43 }
 0x2d9   : > { %1190 = vrot.lane.b32.xlu1 %v1100_v34, %s3391_s14  ;;  %2851 = vmatprep.subr.bf16.mxu1 %v3387_v10 }
 0x2da   : > { %v1162_v45 = vpop.f32.mrb[4].mxu0 }
 0x2db   : > { %v2837_v46 = vpop.f32.mrb[5].mxu0  ;;  %v3935_v58 = vadd.f32 %v2710_v56, %v1162_v45 }
 0x2dc   : > { %v1165_v47 = vpop.f32.mrb[6].mxu0 }
 0x2dd   : > { %1170 = vrot.lane.b32.xlu1 %v1168_v44, %s3390_s5  ;;  %v2838_v49 = vpop.f32.mrb[7].mxu0  ;;  %v1207_v63 = vpack.c.bf16 %v3935_v58, %v3935_v58 }
 0x2df   : > { %2842 = vmatmul.mubr.msk.bf16.vlgmr.msra.gmra.mrb[4].mxu1 %vm1211_vm5, %v1179_v48  ;;  %v1458_v3 = vsel %vm1456_vm6, %v1207_v63, 0 }
 0x2e0   : > { %2853 = vmatprep.mubr.msk.bf16.mxu1 %vm3388_vm2, %v3387_v10 }
 0x2e1   : > { %1173 = vrot.lane.b32.xlu1 %v1168_v44, %s3389_s30 }
 0x2e5   : > { %1176 = vrot.lane.b32.xlu1 %v1168_v44, %s3391_s14 }
 0x347   : > { %v1188_v50 = vpop.permute.xlu0 %1187  ;;  %v1185_v51 = vpop.permute.xlu1 %1184 }
 0x348   : > { %v1195_v52 = vpack.c.bf16 %v1188_v50, %v1188_v50  ;;  %v1194_v53 = vpack.c.bf16 %v1185_v51, %v1185_v51 }
 0x34a   : > { %v1308_v54 = vsel %vm1211_vm5, %v1195_v52, 0  ;;  %v1262_v55 = vsel %vm1211_vm5, %v1194_v53, 0 }
 0x34b   : > { %v1191_v57 = vpop.permute.xlu1 %1190  ;;  %2846 = vmatpush3.bf16.xpose.msra.mxu0 %v1262_v55  ;;  %2852 = vmatpush3.bf16.xpose.msra.mxu1 %v1308_v54 }
 0x34c   : > { %2857 = vmatprep.subr.bf16.mxu0 %v3387_v10  ;;  %2863 = vmatprep.subr.bf16.mxu1 %v3387_v10  ;;  %v1196_v59 = vpack.c.bf16 %v1191_v57, %v1191_v57 }
 0x34e   : > { %v1354_v62 = vsel %vm1211_vm5, %v1196_v59, 0 }
 0x34f   : > { %v1171_v60 = vpop.permute.xlu1 %1170 }
 0x350   : > { %v1180_v61 = vpack.c.bf16 %v1171_v60, %v1171_v60 }
 0x352   : > { %2848 = vmatmul.mubr.msk.bf16.vlgmr.msra.gmra.mrb[8].mxu0 %vm1211_vm5, %v1180_v61 }
 0x353   : > { %2858 = vmatpush3.bf16.xpose.msra.mxu0 %v1354_v62  ;;  %v1174_v0 = vpop.permute.xlu1 %1173  ;;  %2859 = vmatprep.mubr.msk.bf16.mxu0 %vm3388_vm2, %v3387_v10 }
 0x354   : > { %v1181_v2 = vpack.c.bf16 %v1174_v0, %v1174_v0  ;;  %2869 = vmatprep.subr.bf16.mxu0 %v3387_v10 }
 0x356   : > { %2854 = vmatmul.mubr.msk.bf16.vlgmr.msra.gmra.mrb[8].mxu1 %vm1211_vm5, %v1181_v2 }
 0x357   : > { %2864 = vmatpush3.bf16.msra.mxu1 %v1458_v3  ;;  %v1177_v4 = vpop.permute.xlu1 %1176  ;;  %2865 = vmatprep.mubr.msk.bf16.mxu1 %vm3388_vm2, %v3387_v10 }
 0x358   : > { %v1182_v5 = vpack.c.bf16 %v1177_v4, %v1177_v4  ;;  %2875 = vmatprep.subr.bf16.mxu1 %v3387_v10 }
 0x35a   : > { %2860 = vmatmul.mubr.msk.bf16.vlgmr.msra.gmra.mrb[12].mxu0 %vm1211_vm5, %v1182_v5 }
 0x35b   : > { %2871 = vmatprep.mubr.msk.bf16.mxu0 %vm3388_vm2, %v3387_v10 }
 0x3b2   : > { %v1252_v9 = vpop.f32.mrb[4].mxu1 }
 0x3b3   : > { %v1401_v11 = vsel %vm1400_vm7, %v1252_v9, -inf  ;;  %v2843_v12 = vpop.f32.mrb[5].mxu1 }
 0x3b4   : > { %v1255_v13 = vpop.f32.mrb[6].mxu1  ;;  %v1405_v14 = vsel %vm1211_vm5, %v1401_v11, -inf }
 0x3b5   : > { %1406 = vmax.xlane.f32.xlu1 %v1405_v14  ;;  %v2844_v15 = vpop.f32.mrb[7].mxu1 }
 0x425   : > { %v1298_v16 = vpop.f32.mrb[8].mxu0 }
 0x426   : > { %v1402_v17 = vsel %vm1400_vm7, %v1298_v16, -inf  ;;  %v2849_v18 = vpop.f32.mrb[9].mxu0 }
 0x427   : > { %v1301_v19 = vpop.f32.mrb[10].mxu0  ;;  %v1408_v20 = vsel %vm1211_vm5, %v1402_v17, -inf }
 0x428   : > { %1409 = vmax.xlane.f32.xlu0 %v1408_v20  ;;  %v2850_v21 = vpop.f32.mrb[11].mxu0 }
 0x429   : > { %v1344_v22 = vpop.f32.mrb[8].mxu1 }
 0x42a   : > { %v1403_v23 = vsel %vm1400_vm7, %v1344_v22, -inf  ;;  %v2855_v24 = vpop.f32.mrb[9].mxu1 }
 0x42b   : > { %v1347_v25 = vpop.f32.mrb[10].mxu1  ;;  %v1411_v26 = vsel %vm1211_vm5, %v1403_v23, -inf }
 0x42c   : > { %1412 = vmax.xlane.f32.xlu1 %v1411_v26  ;;  %v2856_v27 = vpop.f32.mrb[11].mxu1 }
 0x42d   : > { %v1390_v28 = vpop.f32.mrb[12].mxu0 }
 0x42e   : > { %v1404_v29 = vsel %vm1400_vm7, %v1390_v28, -inf  ;;  %v2861_v30 = vpop.f32.mrb[13].mxu0 }
 0x42f   : > { %v1393_v31 = vpop.f32.mrb[14].mxu0  ;;  %v1414_v32 = vsel %vm1211_vm5, %v1404_v29, -inf  ;;  %v3392_v30 = vmov 0.0|0.0  }
 0x430   : > { %1415 = vmax.xlane.f32.xlu1 %v1414_v32  ;;  %v2862_v33 = vpop.f32.mrb[15].mxu0 }
 0x442   : > { %v1407_v34 = vpop.xlane.xlu1 %1406 }
 0x443   : > { %v1417_v35 = vsub.f32 %v1401_v11, %v1407_v34 }
 0x445   : > { %v1421_v36 = vmul.f32 1.442695, %v1417_v35 }
 0x447   : > { %3138 = vpow2.f32 %v1421_v36 }
 0x451   : > { %v3139_v37 = vpop.eup %3138 }
 0x452   : > { %v1429_v38 = vsel %vm1211_vm5, %v3139_v37, 0.0 }
 0x453   : > { %1430 = vadd.xlane.f32.xlu0 %v1429_v38 }
 0x4b5   : > { %v1410_v39 = vpop.xlane.xlu0 %1409 }
 0x4b6   : > { %v1418_v40 = vsub.f32 %v1402_v17, %v1410_v39 }
 0x4b8   : > { %v1423_v41 = vmul.f32 1.442695, %v1418_v40 }
 0x4b9   : > { %v1413_v42 = vpop.xlane.xlu1 %1412 }
 0x4ba   : > { %3140 = vpow2.f32 %v1423_v41  ;;  %v1419_v43 = vsub.f32 %v1403_v23, %v1413_v42  ;;  %v1766_v42 = vmul.u32 4, %v3952_v7 }
 0x4bc   : > { %v1425_v44 = vmul.f32 1.442695, %v1419_v43  ;;  %v1843_v43 = vadd.s32 1, %v1766_v42  ;;  %vm1767_vm9 = vcmp.eq.s32.totalorder %v3954_v8, %v1766_v42 }
 0x4bd   : > { %v1416_v50 = vpop.xlane.xlu1 %1415 }
 0x4be   : > { %3142 = vpow2.f32 %v1425_v44  ;;  %v1420_v51 = vsub.f32 %v1404_v29, %v1416_v50  ;;  %vm1844_vm8 = vcmp.eq.s32.totalorder %v3954_v8, %v1843_v43  ;;  %v1920_v50 = vadd.s32 2, %v1766_v42 }
 0x4c0   : > { %v1427_v52 = vmul.f32 1.442695, %v1420_v51  ;;  %v1997_v51 = vadd.s32 3, %v1766_v42  ;;  %vm1921_vm10 = vcmp.eq.s32.totalorder %v3954_v8, %v1920_v50  ;;  %v2736_v42 = vld [vmem:[%s918_s25] ss:$0 sm:$0xff] }
 0x4c1   : > { %v2726_v7 = vsel %vm1921_vm10, 1.0, %v3387_v10 }
 0x4c2   : > { %vm1998_vm11 = vcmp.eq.s32.totalorder %v3954_v8, %v1997_v51  ;;  %v3126_v8 = vld [vmem:[%s4278_s26] sm:$0xff]  }
 0x4c4   : > { %v3141_v45 = vpop.eup %3140 }
 0x4c5   : > { %v1432_v46 = vsel %vm1211_vm5, %v3141_v45, 0.0 }
 0x4c6   : > { %1433 = vadd.xlane.f32.xlu1 %v1432_v46 }
 0x4c8   : > { %v3143_v47 = vpop.eup %3142 }
 0x4c9   : > { %v1435_v48 = vsel %vm1211_vm5, %v3143_v47, 0.0 }
 0x4ca   : > { %1436 = vadd.xlane.f32.xlu0 %v1435_v48  ;;  %v2724_v48 = vsel %vm1844_vm8, 1.0, %v3387_v10 }
 0x4d7   : > { %1201 = vrot.lane.b32.xlu1 %v3935_v58, %s3389_s30 }
 0x4e0   : > { %1198 = vrot.lane.b32.xlu0 %v3935_v58, %s3390_s5  ;;  %v1431_v49 = vpop.xlane.xlu0 %1430 }
 0x4e1   : > { %3144 = vrcp.f32 %v1431_v49  ;;  %v2722_v49 = vsel %vm1767_vm9, 1.0, %v3387_v10 }
 0x4e2   : > { %3146 = vpow2.f32 %v1427_v52  ;;  %v2728_v52 = vsel %vm1998_vm11, 1.0, %v3387_v10 }
 0x4eb   : > { %v3145_v53 = vpop.eup %3144 }
 0x4ec   : > { %v1445_v54 = vmul.f32 %v3145_v53, %v3139_v37  ;;  %v3147_v56 = vpop.eup %3146  ;;  %v3127_v53 = vld [vmem:[%s4279_s8 + $0x8] sm:$0xff]  }
 0x4ed   : > { %v1438_v57 = vsel %vm1211_vm5, %v3147_v56, 0.0 }
 0x4ee   : > { %v1449_v55 = vpack.c.bf16 %v1445_v54, %v1445_v54 }
 0x4f0   : > { %2866 = vmatmul.mubr.msk.bf16.vlgmr.msra.gmra.mrb[12].mxu1 %vm1211_vm5, %v1449_v55 }
 0x4f1   : > { %2877 = vmatprep.mubr.msk.bf16.mxu1 %vm3388_vm2, %v3387_v10 }
 0x4fb   : > { %1439 = vadd.xlane.f32.xlu1 %v1438_v57 }
 0x50c   : > { %1204 = vrot.lane.b32.xlu1 %v3935_v58, %s3391_s14 }
 0x553   : > { %v1434_v59 = vpop.xlane.xlu1 %1433 }
 0x554   : > { %3148 = vrcp.f32 %v1434_v59 }
 0x557   : > { %v1437_v60 = vpop.xlane.xlu0 %1436  ;;  %v1202_v61 = vpop.permute.xlu1 %1201 }
 0x558   : > { %3150 = vrcp.f32 %v1437_v60  ;;  %v1209_v62 = vpack.c.bf16 %v1202_v61, %v1202_v61 }
 0x55a   : > { %v1550_v63 = vsel %vm1456_vm6, %v1209_v62, 0 }
 0x55b   : > { %v1199_v0 = vpop.permute.xlu0 %1198  ;;  %2876 = vmatpush3.bf16.msra.mxu1 %v1550_v63 }
 0x55c   : > { %v1208_v2 = vpack.c.bf16 %v1199_v0, %v1199_v0  ;;  %2959 = vmatprep.subr.bf16.mxu1 %v3392_v30 }
 0x55e   : > { %v3149_v3 = vpop.eup %3148  ;;  %v1504_v4 = vsel %vm1456_vm6, %v1208_v2, 0 }
 0x55f   : > { %v1446_v5 = vmul.f32 %v3149_v3, %v3141_v45  ;;  %2870 = vmatpush3.bf16.msra.mxu0 %v1504_v4 }
 0x560   : > { %2881 = vmatprep.subr.bf16.mxu0 %v3387_v10 }
 0x561   : > { %v1450_v6 = vpack.c.bf16 %v1446_v5, %v1446_v5 }
 0x562   : > { %v3151_v58 = vpop.eup %3150 }
 0x563   : > { %v1447_v9 = vmul.f32 %v3151_v58, %v3143_v47  ;;  %2872 = vmatmul.mubr.msk.bf16.vlgmr.msra.gmra.mrb[16].mxu0 %vm1211_vm5, %v1450_v6  ;;  %v2730_v58 = vld [vmem:[%s4281_s7] ss:$0 sm:$0xff] }
 0x564   : > { %2883 = vmatprep.mubr.msk.bf16.mxu0 %vm3388_vm2, %v3387_v10 }
 0x565   : > { %v1451_v11 = vpack.c.bf16 %v1447_v9, %v1447_v9 }
 0x567   : > { %2878 = vmatmul.mubr.msk.bf16.vlgmr.msra.gmra.mrb[16].mxu1 %vm1211_vm5, %v1451_v11 }
 0x568   : > { %2895 = vmatprep.mubr.msk.f32.mxu1 %vm3388_vm2, %v3387_v10 }
 0x588   : > { %v1440_v12 = vpop.xlane.xlu1 %1439 }
 0x589   : > { %3152 = vrcp.f32 %v1440_v12 }
 0x58c   : > { %v1205_v13 = vpop.permute.xlu1 %1204 }
 0x58d   : > { %v1210_v14 = vpack.c.bf16 %v1205_v13, %v1205_v13 }
 0x58f   : > { %v1596_v15 = vsel %vm1456_vm6, %v1210_v14, 0 }
 0x590   : > { %2882 = vmatpush3.bf16.msra.mxu0 %v1596_v15 }
 0x591   : > { %2965 = vmatprep.subr.bf16.mxu0 %v3392_v30 }
 0x593   : > { %v3153_v16 = vpop.eup %3152 }
 0x594   : > { %v1448_v17 = vmul.f32 %v3153_v16, %v3147_v56 }
 0x596   : > { %v1452_v18 = vpack.c.bf16 %v1448_v17, %v1448_v17 }
 0x598   : > { %2884 = vmatmul.mubr.msk.bf16.vlgmr.msra.gmra.mrb[20].mxu0 %vm1211_vm5, %v1452_v18 }
 0x599   : > { %2906 = vmatprep.mubr.msk.f32.mxu0 %vm3388_vm2, %v3387_v10 }
 0x5c3   : > { %v1494_v19 = vpop.f32.mrb[12].mxu1 }
 0x5c4   : > { %v2867_v20 = vpop.f32.mrb[13].mxu1 }
 0x5c5   : > { %v1497_v21 = vpop.f32.mrb[14].mxu1 }
 0x5c6   : > { %v2868_v22 = vpop.f32.mrb[15].mxu1 }
 0x5c7   : > { %v3128_v22 = vld [vmem:[%s762_s13] sm:$0xff]  }
 0x636   : > { %v1540_v23 = vpop.f32.mrb[16].mxu0 }
 0x637   : > { %v3106_v24 = vpack.i.bf16 %v1540_v23, %v1494_v19  ;;  %v2873_v25 = vpop.f32.mrb[17].mxu0 }
 0x638   : > { %v1543_v26 = vpop.f32.mrb[18].mxu0 }
 0x639   : > { %3107 = vxpose.xlu0.b32.start.end [1/1] (short) (narrow) %v3106_v24, 8  ;;  %v2874_v27 = vpop.f32.mrb[19].mxu0 }
 0x63a   : > { %v1586_v28 = vpop.f32.mrb[16].mxu1 }
 0x63b   : > { %v2879_v29 = vpop.f32.mrb[17].mxu1 }
 0x63c   : > { %v1589_v31 = vpop.f32.mrb[18].mxu1 }
 0x63d   : > { %v2880_v32 = vpop.f32.mrb[19].mxu1  ;;  %v2734_v31 = vld [vmem:[%s912_s21] ss:$0 sm:$0xff] }
 0x66b   : > { %v1632_v33 = vpop.f32.mrb[20].mxu0 }
 0x66c   : > { %v3113_v34 = vpack.i.bf16 %v1632_v33, %v1586_v28  ;;  %v2885_v35 = vpop.f32.mrb[21].mxu0 }
 0x66d   : > { %v1635_v36 = vpop.f32.mrb[22].mxu0 }
 0x66e   : > { %3114 = vxpose.xlu1.b32.start.end [1/1] (short) (narrow) %v3113_v34, 8  ;;  %v2886_v37 = vpop.f32.mrb[23].mxu0  ;;  %v2735_v34 = vld [vmem:[%s915_s6] ss:$0 sm:$0xff] }
 0x6b9   : > { %v3108_v38 = vpop.trf.xlu0 }
 0x6ba   : > { %v3112_v39 = vunpack.i.h.bf16 %v3108_v38  ;;  %v3109_v40 = vunpack.i.l.bf16 %v3108_v38  ;;  %v3130_v38 = vld [vmem:[%s3849_s9] sm:$0xff]  }
 0x6bc   : > { %v2960_v41 = vpack.c.bf16 %v3112_v39, %v3109_v40  ;;  %v3131_v39 = vld [vmem:[%s3849_s9 + $0x8] sm:$0xff]   ;;  %v3132_v40 = vld [vmem:[%s3849_s9 + $0x10] sm:$0xff]  }
 0x6be   : > { %2961 = vmatpush3.bf16.msra.mxu1 %v2960_v41  ;;  %2967 = vmatpush3.bf16.msra.mxu0 %v2960_v41 }
 0x6bf   : > { %2962 = vmatprep.subr.bf16.mxu1 %v3392_v30  ;;  %2968 = vmatprep.subr.bf16.mxu0 %v3392_v30 }
 0x6ee   : > { %v3115_v44 = vpop.trf.xlu1 }
 0x6ef   : > { %v3119_v45 = vunpack.i.h.bf16 %v3115_v44  ;;  %v3116_v46 = vunpack.i.l.bf16 %v3115_v44 }
 0x6f1   : > { %v2963_v47 = vpack.c.bf16 %v3119_v45, %v3116_v46 }
 0x6f3   : > { %2964 = vmatpush3.bf16.msra.mxu1 %v2963_v47  ;;  %2970 = vmatpush3.bf16.msra.mxu0 %v2963_v47 }
 0x6f4   : > { %2971 = vmatprep.subr.bf16.mxu1 %v3392_v30  ;;  %2977 = vmatprep.subr.bf16.mxu0 %v3392_v30 }
 0x6f6   : > { %2907 = vmatmul.mubr.msk.f32.vlgmr.msra.gmra.mrb[24].mxu0 %vm938_vm1, %v2724_v48  ;;  %2896 = vmatmul.mubr.msk.f32.vlgmr.msra.gmra.mrb[20].mxu1 %vm938_vm1, %v2722_v49 }
 0x6f7   : > { %2973 = vmatpush3.bf16.msra.mxu1 %v2960_v41  ;;  %2979 = vmatpush3.bf16.msra.mxu0 %v2960_v41  ;;  %v3133_v41 = vld [vmem:[%s3849_s9 + $0x18] sm:$0xff]  }
 0x6f8   : > { %2974 = vmatprep.subr.bf16.mxu1 %v3392_v30  ;;  %2980 = vmatprep.subr.bf16.mxu0 %v3392_v30 }
 0x6f9   : > { %2917 = vmatprep.mubr.msk.f32.mxu1 %vm3388_vm2, %v3387_v10  ;;  %2928 = vmatprep.mubr.msk.f32.mxu0 %vm3388_vm2, %v3387_v10 }
 0x6fb   : > { %2976 = vmatpush3.bf16.msra.mxu1 %v2963_v47  ;;  %2982 = vmatpush3.bf16.msra.mxu0 %v2963_v47 }
 0x6fc   : > { %2931 = vmatprep.subr.bf16.mxu1 %v3387_v10  ;;  %2939 = vmatprep.subr.bf16.mxu0 %v3387_v10 }
 0x6fe   : > { %2918 = vmatmul.mubr.msk.f32.vlgmr.msra.gmra.mrb[22].mxu1 %vm938_vm1, %v2726_v7  ;;  %2929 = vmatmul.mubr.msk.f32.vlgmr.msra.gmra.mrb[26].mxu0 %vm938_vm1, %v2728_v52 }
 0x6ff   : > { %2935 = vmatprep.mubr.msk.bf16.mxu1 %vm3388_vm2, %v3387_v10  ;;  %2943 = vmatprep.mubr.msk.bf16.mxu0 %vm3388_vm2, %v3387_v10 }
 0x700   : > { %2932 = vmatpush3.bf16.msra.mxu1 %v3126_v8  ;;  %2940 = vmatpush3.bf16.msra.mxu0 %v3128_v22 }
 0x701   : > { %2933 = vmatprep.subr.bf16.mxu1 %v3387_v10  ;;  %2941 = vmatprep.subr.bf16.mxu0 %v3387_v10 }
 0x704   : > { %2934 = vmatpush3.bf16.msra.mxu1 %v3127_v53 }
 0x705   : > { %2947 = vmatprep.subr.bf16.mxu1 %v3387_v10 }
 0x7c9   : > { %v1916_v54 = vpop.f32.mrb[24].mxu0  ;;  %v1839_v55 = vpop.f32.mrb[20].mxu1 }
 0x7ca   : > { %2075 = vrot.lane.b32.xlu0 %v1916_v54, %s3393_s12  ;;  %v2897_v56 = vpop.f32.mrb[21].mxu1  ;;  %v2908_v57 = vpop.f32.mrb[25].mxu0 }
 0x7d1   : > { %v1993_v59 = vpop.f32.mrb[22].mxu1  ;;  %v2070_v60 = vpop.f32.mrb[26].mxu0 }
 0x7d2   : > { %2079 = vrot.lane.b32.xlu1 %v1993_v59, %s3394_s19  ;;  %v2919_v61 = vpop.f32.mrb[23].mxu1  ;;  %2083 = vrot.lane.b32.xlu0 %v2070_v60, %s3395_s15  ;;  %v2930_v62 = vpop.f32.mrb[27].mxu0 }
 0x83c   : > { %v2076_v63 = vpop.permute.xlu0 %2075 }
 0x83d   : > { %v2086_v0 = vsel %vm1211_vm5, %v1839_v55, %v2076_v63  ;;  %v2740_v55 = vld [vmem:[%s926_s10] ss:$0 sm:$0xff] }
 0x844   : > { %v2080_v2 = vpop.permute.xlu1 %2079  ;;  %v2084_v3 = vpop.permute.xlu0 %2083 }
 0x845   : > { %v2088_v4 = vsel %vm2087_vm12, %v2086_v0, %v2080_v2 }
 0x846   : > { %v2090_v5 = vsel %vm2089_vm13, %v2088_v4, %v2084_v3 }
 0x847   : > { %v2091_v6 = vpack.c.bf16 %v2090_v5, %v2090_v5 }
 0x849   : > { %2936 = vmatmul.mubr.msk.bf16.vlgmr.msra.gmra.mrb[24].mxu1 %vm938_vm1, %v2091_v6 }
 0x84a   : > { %2955 = vmatprep.mubr.msk.bf16.mxu1 %vm3388_vm2, %v3387_v10  ;;  %2948 = vmatpush3.bf16.msra.mxu1 %v3130_v38 }
 0x84b   : > { %2949 = vmatprep.subr.bf16.mxu1 %v3387_v10 }
 0x84e   : > { %2950 = vmatpush3.bf16.msra.mxu1 %v3131_v39 }
 0x84f   : > { %2951 = vmatprep.subr.bf16.mxu1 %v3387_v10 }
 0x852   : > { %2952 = vmatpush3.bf16.msra.mxu1 %v3132_v40 }
 0x853   : > { %2953 = vmatprep.subr.bf16.mxu1 %v3387_v10 }
 0x856   : > { %2954 = vmatpush3.bf16.msra.mxu1 %v3133_v41 }
 0x91c   : > { %v2152_v9 = vpop.f32.mrb[24].mxu1 }
 0x91d   : > { %v2153_v11 = vadd.f32 %v2730_v58, %v2152_v9  ;;  %v2937_v12 = vpop.f32.mrb[25].mxu1 }
 0x91e   : > { %v2155_v13 = vpop.f32.mrb[26].mxu1 }
 0x91f   : > { %v4039_v14 = vadd.f32 %v2153_v11, %v3862_v1  ;;  %v2938_v15 = vpop.f32.mrb[27].mxu1  ;;  %v3129_v1 = vld [vmem:[%s762_s13 + $0x8] sm:$0xff]  }
 0x920   : > { %2942 = vmatpush3.bf16.msra.mxu0 %v3129_v1 }
 0x921   : > { %v2161_v16 = vsel %vm938_vm1, %v4039_v14, 0.0 }
 0x922   : > { %2162 = vadd.xlane.f32.xlu1 %v2161_v16  ;;  %v2747_v16 = vld [vmem:[%s4286_s27] ss:$0 sm:$0xff] (!%p2746_p11) }
 0x9af   : > { %v2163_v17 = vpop.xlane.xlu1 %2162 }
 0x9b0   : > { %v2164_v18 = vmul.f32 0.03125, %v2163_v17 }
 0x9b2   : > { %v2165_v19 = vsub.f32 %v4039_v14, %v2164_v18 }
 0x9b4   : > { %v2166_v20 = vmul.f32 %v2165_v19, %v2165_v19  ;;  %v2177_v32 = vmul.f32 %v2734_v31, %v2165_v19  ;;  %v2748_v19 = vld [vmem:[%s4287_s16] ss:$0 sm:$0xff] (!%p2746_p11) }
 0x9b6   : > { %v2167_v21 = vsel %vm938_vm1, %v2166_v20, 0.0 }
 0x9b7   : > { %2168 = vadd.xlane.f32.xlu0 %v2167_v21 }
 0xa44   : > { %v2169_v23 = vpop.xlane.xlu0 %2168 }
 0xa45   : > { %v2170_v24 = vmul.f32 0.032258064, %v2169_v23 }
 0xa47   : > { %3154 = vrsqrt.f32 %v2170_v24  ;;  %vm2180_vm14 = vcmp.eq.f32.partialorder %v2170_v24, inf  ;;  %v2183_v27 = vand.u32 2147483648, %v2170_v24  ;;  %vm2182_vm15 = vcmp.eq.f32.partialorder %v2170_v24, 0.0 }
 0xa51   : > { %v3155_v25 = vpop.eup %3154 }
 0xa52   : > { %v2179_v26 = vmul.f32 %v3155_v25, %v2170_v24 }
 0xa54   : > { %v2181_v28 = vsel %vm2180_vm14, %v2170_v24, %v2179_v26 }
 0xa55   : > { %v2184_v29 = vsel %vm2182_vm15, %v2183_v27, %v2181_v28 }
 0xa56   : > { %v2185_v30 = vadd.f32 1e-06, %v2184_v29 }
 0xa58   : > { %3156 = vrcp.f32 %v2185_v30 }
 0xa62   : > { %v3157_v33 = vpop.eup %3156 }
 0xa63   : > { %v2187_v35 = vmul.f32 %v3157_v33, %v2177_v32 }
 0xa65   : > { %v2194_v36 = vadd.f32 %v2735_v34, %v2187_v35 }
 0xa67   : > { %v2195_v37 = vpack.c.bf16 %v2194_v36, %v2194_v36 }
 0xa69   : > { %2944 = vmatmul.mubr.msk.bf16.vlgmr.msra.gmra.mrb[28].mxu0 %vm938_vm1, %v2195_v37 }
 0xb3c   : > { %v2256_v43 = vpop.f32.mrb[28].mxu0 }
 0xb3d   : > { %v2257_v44 = vadd.f32 %v2736_v42, %v2256_v43  ;;  %v2945_v45 = vpop.f32.mrb[29].mxu0 }
 0xb3e   : > { %v2259_v46 = vpop.f32.mrb[30].mxu0 }
 0xb3f   : > { %v2263_v47 = vmul.f32 %v2257_v44, %v2257_v44  ;;  %v2946_v48 = vpop.f32.mrb[31].mxu0  ;;  %v2262_v52 = vmul.f32 0.5, %v2257_v44 }
 0xb41   : > { %v2264_v49 = vmul.f32 %v2263_v47, %v2257_v44 }
 0xb43   : > { %v2265_v50 = vmul.f32 0.044715, %v2264_v49 }
 0xb45   : > { %v2266_v51 = vadd.f32 %v2265_v50, %v2257_v44 }
 0xb47   : > { %v2267_v7 = vmul.f32 0.7978846, %v2266_v51 }
 0xb49   : > { %3158 = vtanh.f32 %v2267_v7 }
 0xb53   : > { %v3159_v10 = vpop.eup %3158 }
 0xb54   : > { %v2269_v8 = vadd.f32 1.0, %v3159_v10 }
 0xb56   : > { %v2270_v53 = vmul.f32 %v2269_v8, %v2262_v52 }
 0xb58   : > { %v2271_v54 = vpack.c.bf16 %v2270_v53, %v2270_v53 }
 0xb5a   : > { %2956 = vmatmul.mubr.msk.bf16.vlgmr.msra.gmra.mrb[28].mxu1 %vm2311_vm0, %v2271_v54 }
 0xc2c   : > { %2360 = sbr.rel (%p2746_p11) target bundleno = 3449 (0xd79), region = 116 }
 0xc2d   : > { %v2349_v56 = vpop.f32.mrb[28].mxu1 }
 0xc2e   : > { %v2350_v57 = vadd.f32 %v2740_v55, %v2349_v56  ;;  %v2957_v59 = vpop.f32.mrb[29].mxu1 }
 0xc2f   : > { %v2352_v60 = vpop.f32.mrb[30].mxu1 }
 0xc30   : > { %v2355_v61 = vadd.f32 %v2350_v57, %v4039_v14  ;;  %v2958_v62 = vpop.f32.mrb[31].mxu1 }
 0xc32   : > { %2356 = vst.msk [vmem:[#allocation2] sm:$0xff] %vm938_vm1, %v2355_v61  ;;  %v2363_v63 = vsel (!%p2746_p11), %vm938_vm1, %v2355_v61, 0.0 }
 0xc33   : > { %2364 = vadd.xlane.f32.xlu0 %v2363_v63 }
 0xcc0   : > { %v2365_v0 = vpop.xlane.xlu0 %2364 }
 0xcc1   : > { %v2366_v2 = vmul.f32 0.03125, %v2365_v0 }
 0xcc3   : > { %v2367_v3 = vsub.f32 %v2355_v61, %v2366_v2 }
 0xcc5   : > { %v2368_v4 = vmul.f32 %v2367_v3, %v2367_v3  ;;  %v2379_v17 = vmul.f32 %v2747_v16, %v2367_v3 }
 0xcc7   : > { %v2369_v5 = vsel %vm938_vm1, %v2368_v4, 0.0 }
 0xcc8   : > { %2370 = vadd.xlane.f32.xlu0 %v2369_v5 }
 0xd55   : > { %v2371_v6 = vpop.xlane.xlu0 %2370 }
 0xd56   : > { %v2372_v58 = vmul.f32 0.032258064, %v2371_v6 }
 0xd58   : > { %3160 = vrsqrt.f32 %v2372_v58  ;;  %vm2382_vm2 = vcmp.eq.f32.partialorder %v2372_v58, inf  ;;  %v2385_v12 = vand.u32 2147483648, %v2372_v58  ;;  %vm2384_vm3 = vcmp.eq.f32.partialorder %v2372_v58, 0.0 }
 0xd62   : > { %v3161_v9 = vpop.eup %3160 }
 0xd63   : > { %v2381_v11 = vmul.f32 %v3161_v9, %v2372_v58 }
 0xd65   : > { %v2383_v13 = vsel %vm2382_vm2, %v2372_v58, %v2381_v11 }
 0xd66   : > { %v2386_v14 = vsel %vm2384_vm3, %v2385_v12, %v2383_v13 }
 0xd67   : > { %v2387_v15 = vadd.f32 1e-06, %v2386_v14 }
 0xd69   : > { %3162 = vrcp.f32 %v2387_v15 }
 0xd73   : > { %v3163_v18 = vpop.eup %3162 }
 0xd74   : > { %v2389_v20 = vmul.f32 %v3163_v18, %v2379_v17 }
 0xd76   : > { %v2396_v21 = vadd.f32 %v2748_v19, %v2389_v20 }
 0xd78   : > { %2397 = vst.msk [vmem:[%s3858_s29] sm:$0xff] %vm938_vm1, %v2396_v21 }
 0xd79 PF: > { %s4288_s28 = sld [smem:[#allocation18_spill]]  ;;  %s4289_s26 = sld [smem:[#allocation25_spill]] }
 0xd7a   : > { %s4290_s15 = sld [smem:[#allocation46_spill]]  ;;  %s2412_s24 = sshll.u32 %s3858_s29, 4  ;;  %s2413_s24 = int_to_ptr.vmem [resolvable:$true] %s2412_s24 }
 0xd7b   : > { %s2399_s22 = scalar_lea.sflag [#allocation5], %s3768_s0  ;;  %s3254_s7 = scalar_lea.vmem %s2413_s24, 128 }
 0xd7c   : > { %p3255_p3 = scmp.ne.s32.totalorder %s2413_s24, %s3254_s7  ;;  %s3396_s23 = smov [#allocation9]  }
 0xd7d   : > { %s3258_s13 = sshll.u32 %s3396_s23, 4  ;;  %s3259_s13 = int_to_ptr.vmem [resolvable:$false] %s3258_s13 }
 0xd7e   : > { %s3260_s1 = scalar_lea.vmem %s3259_s13, 256  ;;  %p3261_p13 = scmp.lt.s32.totalorder %s2413_s24, %s3259_s13 }
 0xd7f   : > { %s2750_s8 = sshll.u32 %s4288_s28, 7  ;;  %p4291_p9 = scmp.ne.s32.totalorder %s4289_s26, 0 }
 0xd80   : > { %s4095_s18 = scalar_lea.hbm %s4290_s15, %s2750_s8  ;;  %p3262_p12 = scmp.lt.s32.totalorder %s3260_s1, %s3254_s7 }
 0xd81   : > { %p3256_p5 = pnand %p3255_p3, %p4291_p9 }
 0xd82   : > { %p3263_p2 = por %p3262_p12, %p3261_p13 }
 0xd83   : > { %p3257_p8 = pneg %p3256_p5 }
 0xd85   : > { %p3264_p1 = pnand %p3263_p2, %p3257_p8 }
 0xd87   : > { %3267 = shalt.err (!%p3264_p1)
}
 0xd88   : > { %s3268_s0 = scalar_lea.hbm %s4095_s18, 128  ;;  %s3272_s11 = scalar_lea.hbm %s4290_s15, 256 }
 0xd89   : > { %p3269_p10 = scmp.ne.s32.totalorder %s4095_s18, %s3268_s0  ;;  %p3273_p7 = scmp.lt.u32.totalorder %s4095_s18, %s4290_s15 }
 0xd8a   : > { %p3274_p4 = scmp.lt.u32.totalorder %s3272_s11, %s3268_s0  ;;  %p3276_p3 = scmp.lt.u32.totalorder %s3268_s0, %s4095_s18 }
 0xd8b   : > { %p3270_p0 = pnand %p3269_p10, %p4291_p9 }
 0xd8c   : > { %p3275_p11 = por %p3274_p4, %p3273_p7 }
 0xd8d   : > { %p3271_p6 = pneg %p3270_p0 }
 0xd8e   : > { %p3277_p5 = por %p3276_p3, %p3275_p11 }
 0xd90   : > { %p3278_p8 = pnand %p3277_p5, %p3271_p6 }
 0xd92   : > { %3281 = shalt.err (!%p3278_p8)
}
 0xd93   : > { %2989 = dma.vmem_to_hbm [thread:$0]  (%p4291_p9), %s2413_s24, 128, %s4095_s18, %s2399_s22  }
 0xd94 PF: > { %s4292_s6 = sld [smem:[#allocation21_spill]]  ;;  %s4293_s30 = sld [smem:[#allocation15_spill]] }
 0xd95   : > { %s4294_s25 = sld [smem:[#allocation27_spill]] }
 0xd9a   : > { %p3006_p13 = scmp.ge.s32.totalorder %s4292_s6, 2  ;;  %s2424_s9 = sand.u32 1, %s4293_s30  }
 0xd9b   : > { %p4295_p12 = scmp.ne.s32.totalorder %s4294_s25, 0  ;;  %s2425_s5 = scalar_lea.sflag [#allocation5], %s2424_s9 }
 0xd9d   : > { %p3002_p2 = pnand %p3006_p13, %p4295_p12 }
 0xd9f   : > { %3335 = dma.done.wait (!%p3002_p2), %s2425_s5, 128  }
 0xda0   : > { %3337 = vsyncadd (!%p3002_p2), %s2425_s5, 4294967168  ;;  %s38_s3 = sadd.s32 1, %s4292_s6   ;;  %s4296_s0 = sld [smem:[#allocation13_spill]] }
 0xda1   : > { %p35_p1 = scmp.ge.s32.totalorder %s38_s3, 6   ;;  %s4297_s30 = sld [smem:[#allocation14_spill]] }
 0xda2   : > { %s4298_s20 = sld [smem:[#allocation23_spill]]  ;;  %s4299_s21 = sld [smem:[#allocation16_spill]] }
 0xda3   : > { %s4300_s1 = sld [smem:[#allocation17_spill]]  ;;  %s4301_s22 = sld [smem:[#allocation26_spill]] }
 0xda4   : > { %s4302_s2 = sld [smem:[#allocation19_spill]]  ;;  %s4303_s23 = sld [smem:[#allocation20_spill]] }
 0xda5   : > { %s4304_s24 = sld [smem:[#allocation22_spill]]  ;;  %s4305_s25 = sld [smem:[#allocation24_spill]] }
 0xda6   :  { %37 = sbr.rel (!%p35_p1) target bundleno = 31 (0x1f), region = 215 }
 0xdad   :  { %2430 = vsyncpa [#allocation4], 1 }
 0xdae   :  { %2432 = vsyncpa [#allocation4 + $0x1], 1 }
 0xdaf   :  { %2433 = vsyncpa [#allocation7], 1 }
 0xdb0   :  { %2435 = vsyncpa [#allocation7 + $0x1], 1 }
 0xdb1   :  { %2436 = vsyncpa [#allocation5], 1 }
 0xdb2   :  { %2438 = vsyncpa [#allocation5 + $0x1], 1 }

</bundles_post_ra>
